<compile_context>
chip_gen: v7x
topology: tpu7x:2x2x1
jax: 0.10.0
libtpu: 0.0.40
codegen_flags: <defaults>
</compile_context>

<pallas_src>
import functools

import jax
import jax.numpy as jnp
from jax.experimental import pallas as pl
from jax.experimental.pallas import tpu as pltpu


# -----------------------------------------------------------------------------
# Pallas kernels
# -----------------------------------------------------------------------------
def _conv_kernel(*refs, n_in, taps, dil, th, w_out, act):
    """Fused conv (im2col-in-K) + affine + activation for one spatial tile.

    refs = x_0..x_{n_in-1}, w_0..w_{n_in-1}, scale, bias, out
      x_k : (TH + 2d, W + 2d, Ci_k)  bf16   (halo-included row tile)
      w_k : (taps * Ci_k, Co)        bf16
      scale, bias : (1, Co)          f32
      out : (TH * W, Co)
    """
    xs = refs[:n_in]
    ws = refs[n_in:2 * n_in]
    scale_ref, bias_ref, o_ref = refs[2 * n_in:]

    acc = None
    for x_ref, w_ref in zip(xs, ws):
        ci = x_ref.shape[-1]
        if taps == 1:
            col = x_ref[...].reshape(th * w_out, ci)
        else:
            # Build the 9 taps from the VMEM-resident halo tile and fold them
            # into the contraction dimension (im2col): one big-K MXU pass.
            pieces = [
                x_ref[kh * dil:kh * dil + th, kw * dil:kw * dil + w_out, :]
                for kh in range(3) for kw in range(3)
            ]
            col = jnp.concatenate(pieces, axis=-1).reshape(th * w_out, taps * ci)
        part = jnp.dot(col, w_ref[...], preferred_element_type=jnp.float32)
        acc = part if acc is None else acc + part

    y = acc * scale_ref[...] + bias_ref[...]
    if act == 'relu':
        y = jnp.maximum(y, 0.0)
    elif act == 'sigmoid':
        y = 1.0 / (1.0 + jnp.exp(-y))
    o_ref[...] = y.astype(o_ref.dtype)


def _sigmoid_kernel(x_ref, o_ref):
    x = x_ref[...]
    o_ref[...] = 1.0 / (1.0 + jnp.exp(-x))


# -----------------------------------------------------------------------------
# Tiling helpers
# -----------------------------------------------------------------------------
def _choose_th(H, W, cis, Co, d, T):
    """Rows per spatial tile so the per-tile working set stays well under VMEM."""
    Wp = W + 2 * d
    per_row = 0
    for ci in cis:
        per_row += Wp * ci * 2 * 2          # bf16 halo input, double-buffered
        per_row += W * T * ci * 2           # in-VMEM im2col
    per_row += W * Co * 4                   # f32 accumulator
    per_row += W * Co * 4 * 2               # output, double-buffered (<= f32)
    budget = 12 * 1024 * 1024               # conservative across v5e/v6e/v7x
    th = int(budget // max(per_row, 1))
    th = max(1, min(H, th))
    if th < H and th >= 8:
        th = (th // 8) * 8                  # nicer sublane alignment
    return th


def _make_tiles(x, d, TH, num_tiles):
    """(N,H,W,C) -> (N*num_tiles, TH+2d, W+2d, C) halo'd row tiles (bf16)."""
    N, H, W, C = x.shape
    if d > 0:
        x = jnp.pad(x, ((0, 0), (d, d), (d, d), (0, 0)))
    Hp = H + 2 * d
    need = num_tiles * TH + 2 * d
    if need > Hp:
        x = jnp.pad(x, ((0, 0), (0, need - Hp), (0, 0), (0, 0)))
    if num_tiles == 1:
        tiles = x[:, None]
    else:
        tiles = jnp.stack(
            [x[:, i * TH: i * TH + TH + 2 * d] for i in range(num_tiles)], axis=1)
    return tiles.reshape(N * num_tiles, TH + 2 * d, W + 2 * d, C)


# -----------------------------------------------------------------------------
# Cached pallas_call builders (one build per unique signature)
# -----------------------------------------------------------------------------
_VMEM_LIMIT = 32 * 1024 * 1024


@functools.lru_cache(maxsize=None)
def _build_conv(N, H, W, cis, Co, T, d, act, out_dtype_name):
    if T == 1:
        d = 0
    out_dtype = jnp.dtype(out_dtype_name)
    TH = _choose_th(H, W, cis, Co, d, T)
    num_tiles = -(-H // TH)
    G = N * num_tiles
    THh = TH + 2 * d
    Wp = W + 2 * d
    M = TH * W

    kernel = functools.partial(_conv_kernel, n_in=len(cis), taps=T, dil=d,
                               th=TH, w_out=W, act=act)

    in_specs = []
    for ci in cis:                      # halo'd activation tiles
        in_specs.append(pl.BlockSpec((None, THh, Wp, ci),
                                     lambda g: (g, 0, 0, 0)))
    for ci in cis:                      # per-input weight slices (resident)
        in_specs.append(pl.BlockSpec((T * ci, Co), lambda g: (0, 0)))
    in_specs.append(pl.BlockSpec((1, Co), lambda g: (0, 0)))   # scale
    in_specs.append(pl.BlockSpec((1, Co), lambda g: (0, 0)))   # bias

    call = pl.pallas_call(
        kernel,
        out_shape=jax.ShapeDtypeStruct((G, M, Co), out_dtype),
        grid_spec=pltpu.PrefetchScalarGridSpec(
            num_scalar_prefetch=0,
            grid=(G,),
            in_specs=in_specs,
            out_specs=pl.BlockSpec((None, M, Co), lambda g: (g, 0, 0)),
        ),
        compiler_params=pltpu.CompilerParams(
            dimension_semantics=("parallel",),
            vmem_limit_bytes=_VMEM_LIMIT),
    )

    def fn(xs, w, scale, bias):
        tiles = [_make_tiles(x.astype(jnp.bfloat16), d, TH, num_tiles) for x in xs]
        ws = []
        off = 0
        for ci in cis:
            ws.append(w[:, off:off + ci, :].reshape(T * ci, Co).astype(jnp.bfloat16))
            off += ci
        y = call(*tiles, *ws,
                 scale.reshape(1, Co).astype(jnp.float32),
                 bias.reshape(1, Co).astype(jnp.float32))
        y = y.reshape(N, num_tiles * TH, W, Co)[:, :H]
        return y

    # Inner jit keeps a per-signature trace cache; it inlines under the
    # top-level jit, so there is no extra dispatch at runtime.
    return jax.jit(fn)


@functools.lru_cache(maxsize=None)
def _build_sigmoid(R, TR):
    return jax.jit(pl.pallas_call(
        _sigmoid_kernel,
        out_shape=jax.ShapeDtypeStruct((R, 1024), jnp.float32),
        grid_spec=pltpu.PrefetchScalarGridSpec(
            num_scalar_prefetch=0,
            grid=(R // TR,),
            in_specs=[pl.BlockSpec((TR, 1024), lambda i: (i, 0))],
            out_specs=pl.BlockSpec((TR, 1024), lambda i: (i, 0)),
        ),
        compiler_params=pltpu.CompilerParams(
            dimension_semantics=("parallel",),
            vmem_limit_bytes=_VMEM_LIMIT),
    ))


def apply_conv(xs, p, act=None, out_dtype=jnp.float32):
    """Fused conv+affine+act.  xs: one NHWC array or a tuple (fused concat)."""
    if not isinstance(xs, (list, tuple)):
        xs = (xs,)
    N, H, W = xs[0].shape[:3]
    cis = tuple(int(x.shape[-1]) for x in xs)
    T, Ci_tot, Co = p['w'].shape
    assert Ci_tot == sum(cis)
    fn = _build_conv(int(N), int(H), int(W), cis, int(Co), int(T),
                     int(p['d']), act, jnp.dtype(out_dtype).name)
    return fn(list(xs), p['w'], p['scale'], p['bias'])


def rebnconv(xs, p):
    return apply_conv(xs, p, act='relu', out_dtype=jnp.bfloat16)


def pallas_sigmoid(x):
    """Lane-dense elementwise sigmoid over an arbitrarily shaped f32 tensor."""
    shape = x.shape
    flat = x.reshape(-1).astype(jnp.float32)
    L = flat.shape[0]
    r0 = -(-L // 1024)
    TR = min(r0, 128)
    R = -(-r0 // TR) * TR
    pad = R * 1024 - L
    if pad:
        flat = jnp.pad(flat, (0, pad))
    y = _build_sigmoid(R, TR)(flat.reshape(R, 1024))
    return y.reshape(-1)[:L].reshape(shape)


# -----------------------------------------------------------------------------
# Plain-JAX glue: ceil-mode maxpool and bilinear (align_corners=False) upsample
# -----------------------------------------------------------------------------
def maxpool2_ceil(x):  # NHWC, kernel 2, stride 2, ceil_mode=True
    n, h, w, c = x.shape
    ph, pw = h % 2, w % 2
    return jax.lax.reduce_window(
        x, jnp.array(-jnp.inf, dtype=x.dtype), jax.lax.max,
        window_dimensions=(1, 2, 2, 1),
        window_strides=(1, 2, 2, 1),
        padding=((0, 0), (0, ph), (0, pw), (0, 0)))


def _resize_coords(in_size, out_size):
    scale = in_size / out_size
    src = (jnp.arange(out_size, dtype=jnp.float32) + 0.5) * scale - 0.5
    src = jnp.maximum(src, 0.0)
    i0 = jnp.floor(src).astype(jnp.int32)
    i0 = jnp.minimum(i0, in_size - 1)
    i1 = jnp.minimum(i0 + 1, in_size - 1)
    w1 = src - i0.astype(jnp.float32)
    w0 = 1.0 - w1
    return i0, i1, w0, w1


def upsample_bilinear(x, oh, ow):
    # TODO(synk): legacy F.upsample(mode='bilinear') default align_corners differs
    # across PyTorch versions; this implements align_corners=False.
    n, h, w, c = x.shape
    if (h, w) == (oh, ow):
        return x
    y0, y1, wy0, wy1 = _resize_coords(h, oh)
    x0, x1, wx0, wx1 = _resize_coords(w, ow)
    r0 = x[:, y0, :, :]
    r1 = x[:, y1, :, :]
    rows = r0 * wy0[None, :, None, None] + r1 * wy1[None, :, None, None]
    c0 = rows[:, :, x0, :]
    c1 = rows[:, :, x1, :]
    return c0 * wx0[None, None, :, None] + c1 * wx1[None, None, :, None]


def upsample_like(src, tar):
    out = upsample_bilinear(src.astype(jnp.float32), tar.shape[1], tar.shape[2])
    return out.astype(src.dtype)


# -----------------------------------------------------------------------------
# Deterministic parameter generation
# -----------------------------------------------------------------------------
class ParamGen:
    def __init__(self, key):
        self.key = key
        self.count = 0

    def next(self, shape, scale=0.1):
        self.count += 1
        k = jax.random.fold_in(self.key, self.count)
        return jax.random.normal(k, shape, jnp.float32) * scale


_BN_EPS = 1e-5


def make_rebnconv(pg, ci, co, dirate):
    """Conv3x3(pad=d, dil=d, bias) + BatchNorm(eval) + ReLU, pre-folded."""
    w = pg.next((9, ci, co), 0.2 / (ci ** 0.5))
    b = pg.next((co,), 0.05)
    gamma = 1.0 + pg.next((co,), 0.05)
    beta = pg.next((co,), 0.05)
    mean = pg.next((co,), 0.05)
    var = jnp.abs(pg.next((co,), 0.05)) + 1.0
    scale = gamma / jnp.sqrt(var + _BN_EPS)
    bias = (b - mean) * scale + beta
    return dict(w=w, scale=scale, bias=bias, d=dirate, is_zero=False)


def make_conv(pg, ci, co, ksize, zero=False):
    """Plain Conv2d (no BN / ReLU)."""
    T = ksize * ksize
    d = 1 if ksize == 3 else 0
    if zero:
        w = jnp.zeros((T, ci, co), jnp.float32)
        b = jnp.zeros((co,), jnp.float32)
    else:
        w = pg.next((T, ci, co), 0.2 / (ci ** 0.5))
        b = pg.next((co,), 0.05)
    return dict(w=w, scale=jnp.ones((co,), jnp.float32), bias=b, d=d,
                is_zero=bool(zero))


def make_rsu(pg, L, in_ch, mid_ch, out_ch):
    p = {'L': L}
    p['in'] = make_rebnconv(pg, in_ch, out_ch, 1)
    p['e1'] = make_rebnconv(pg, out_ch, mid_ch, 1)
    for i in range(2, L):
        p[f'e{i}'] = make_rebnconv(pg, mid_ch, mid_ch, 1)
    p[f'e{L}'] = make_rebnconv(pg, mid_ch, mid_ch, 2)
    for i in range(L - 1, 1, -1):
        p[f'd{i}'] = make_rebnconv(pg, mid_ch * 2, mid_ch, 1)
    p['d1'] = make_rebnconv(pg, mid_ch * 2, out_ch, 1)
    return p


def make_rsu4f(pg, in_ch, mid_ch, out_ch):
    p = {}
    p['in'] = make_rebnconv(pg, in_ch, out_ch, 1)
    p['e1'] = make_rebnconv(pg, out_ch, mid_ch, 1)
    p['e2'] = make_rebnconv(pg, mid_ch, mid_ch, 2)
    p['e3'] = make_rebnconv(pg, mid_ch, mid_ch, 4)
    p['e4'] = make_rebnconv(pg, mid_ch, mid_ch, 8)
    p['d3'] = make_rebnconv(pg, mid_ch * 2, mid_ch, 4)
    p['d2'] = make_rebnconv(pg, mid_ch * 2, mid_ch, 2)
    p['d1'] = make_rebnconv(pg, mid_ch * 2, out_ch, 1)
    return p


def make_params(key, in_ch=3, out_ch=1):
    pg = ParamGen(key)
    P = {}
    P['zero_conv0'] = make_conv(pg, in_ch, in_ch, 1, zero=True)
    P['ctrl_stage1'] = make_rsu(pg, 7, in_ch, 16, 64)
    P['ctrl_stage2'] = make_rsu(pg, 6, 64, 16, 64)
    P['ctrl_stage3'] = make_rsu(pg, 5, 64, 16, 64)
    P['ctrl_stage4'] = make_rsu(pg, 4, 64, 16, 64)
    P['ctrl_stage5'] = make_rsu4f(pg, 64, 16, 64)
    P['ctrl_stage6'] = make_rsu4f(pg, 64, 16, 64)
    for i in range(1, 7):
        P[f'zero_conv{i}'] = make_conv(pg, 64, 64, 1, zero=True)
    P['stage1'] = make_rsu(pg, 7, in_ch, 16, 64)
    P['stage2'] = make_rsu(pg, 6, 64, 16, 64)
    P['stage3'] = make_rsu(pg, 5, 64, 16, 64)
    P['stage4'] = make_rsu(pg, 4, 64, 16, 64)
    P['stage5'] = make_rsu4f(pg, 64, 16, 64)
    P['stage6'] = make_rsu4f(pg, 64, 16, 64)
    P['stage5d'] = make_rsu4f(pg, 128, 16, 64)
    P['stage4d'] = make_rsu(pg, 4, 128, 16, 64)
    P['stage3d'] = make_rsu(pg, 5, 128, 16, 64)
    P['stage2d'] = make_rsu(pg, 6, 128, 16, 64)
    P['stage1d'] = make_rsu(pg, 7, 128, 16, 64)
    for i in range(1, 7):
        P[f'side{i}'] = make_conv(pg, 64, out_ch, 3)
    P['outconv'] = make_conv(pg, 6 * out_ch, out_ch, 1)
    return P


# -----------------------------------------------------------------------------
# RSU blocks (forward).  `xs` may be one array or a tuple (fused concat input).
# -----------------------------------------------------------------------------
def rsu_forward(xs, p):
    L = p['L']
    hxin = rebnconv(xs, p['in'])
    enc = [rebnconv(hxin, p['e1'])]
    for i in range(2, L):
        enc.append(rebnconv(maxpool2_ceil(enc[-1]), p[f'e{i}']))
    top = rebnconv(enc[-1], p[f'e{L}'])                   # dilated, same res
    d = rebnconv((top, enc[-1]), p[f'd{L - 1}'])          # fused concat
    for i in range(L - 2, 0, -1):
        d = rebnconv((upsample_like(d, enc[i - 1]), enc[i - 1]), p[f'd{i}'])
    return d + hxin


def rsu4f_forward(xs, p):
    hxin = rebnconv(xs, p['in'])
    hx1 = rebnconv(hxin, p['e1'])
    hx2 = rebnconv(hx1, p['e2'])
    hx3 = rebnconv(hx2, p['e3'])
    hx4 = rebnconv(hx3, p['e4'])
    hx3d = rebnconv((hx4, hx3), p['d3'])
    hx2d = rebnconv((hx3d, hx2), p['d2'])
    hx1d = rebnconv((hx2d, hx1), p['d1'])
    return hx1d + hxin


# -----------------------------------------------------------------------------
# Full ControlU2Netpseg forward
# -----------------------------------------------------------------------------
def _zero_conv(x, p):
    """zero_module conv: structurally zero => exact zeros; skip the work.

    Under the top-level jit this makes the entire control branch dead code
    (its only consumers are the zero-convs), so JAX/XLA DCE removes it while
    preserving the module's exact forward semantics.
    """
    if p['is_zero']:
        return None
    return apply_conv(x, p, act=None, out_dtype=jnp.bfloat16)


def _add_ctrl(h, c):
    return h if c is None else h + c


def control_u2netp_forward(params, x_nchw, seg_nchw):
    x = jnp.transpose(x_nchw, (0, 2, 3, 1)).astype(jnp.float32)
    seg = jnp.transpose(seg_nchw, (0, 2, 3, 1)).astype(jnp.float32)

    # ---- control branch (zero-convs are exact zeros -> skipped / DCE'd) ----
    if params['zero_conv0']['is_zero']:
        hint = jnp.zeros_like(seg, dtype=jnp.bfloat16)
    else:
        hint = apply_conv(seg, params['zero_conv0'], None, jnp.bfloat16)
    outs = []
    chx1 = rsu_forward(hint, params['ctrl_stage1'])
    outs.append(_zero_conv(chx1, params['zero_conv1']))
    chx2 = rsu_forward(maxpool2_ceil(chx1), params['ctrl_stage2'])
    outs.append(_zero_conv(chx2, params['zero_conv2']))
    chx3 = rsu_forward(maxpool2_ceil(chx2), params['ctrl_stage3'])
    outs.append(_zero_conv(chx3, params['zero_conv3']))
    chx4 = rsu_forward(maxpool2_ceil(chx3), params['ctrl_stage4'])
    outs.append(_zero_conv(chx4, params['zero_conv4']))
    chx5 = rsu4f_forward(maxpool2_ceil(chx4), params['ctrl_stage5'])
    outs.append(_zero_conv(chx5, params['zero_conv5']))
    chx6 = rsu4f_forward(maxpool2_ceil(chx5), params['ctrl_stage6'])
    outs.append(_zero_conv(chx6, params['zero_conv6']))

    # ---- frozen encoder (torch.no_grad in the original) ----
    hx1 = rsu_forward(x, params['stage1'])
    hx2 = rsu_forward(maxpool2_ceil(hx1), params['stage2'])
    hx3 = rsu_forward(maxpool2_ceil(hx2), params['stage3'])
    hx4 = rsu_forward(maxpool2_ceil(hx3), params['stage4'])
    hx5 = rsu4f_forward(maxpool2_ceil(hx4), params['stage5'])
    hx6 = rsu4f_forward(maxpool2_ceil(hx5), params['stage6'])

    # ---- decoder with control injection (concat fused into the RSU `in` conv)
    hx6 = _add_ctrl(hx6, outs.pop())
    hx5d = rsu4f_forward((upsample_like(hx6, hx5), _add_ctrl(hx5, outs.pop())),
                         params['stage5d'])
    hx4d = rsu_forward((upsample_like(hx5d, hx4), _add_ctrl(hx4, outs.pop())),
                       params['stage4d'])
    hx3d = rsu_forward((upsample_like(hx4d, hx3), _add_ctrl(hx3, outs.pop())),
                       params['stage3d'])
    hx2d = rsu_forward((upsample_like(hx3d, hx2), _add_ctrl(hx2, outs.pop())),
                       params['stage2d'])
    hx1d = rsu_forward((upsample_like(hx2d, hx1), _add_ctrl(hx1, outs.pop())),
                       params['stage1d'])

    # ---- side outputs ----
    d1 = apply_conv(hx1d, params['side1'], None, jnp.float32)
    d2 = upsample_like(apply_conv(hx2d, params['side2'], None, jnp.float32), d1)
    d3 = upsample_like(apply_conv(hx3d, params['side3'], None, jnp.float32), d1)
    d4 = upsample_like(apply_conv(hx4d, params['side4'], None, jnp.float32), d1)
    d5 = upsample_like(apply_conv(hx5d, params['side5'], None, jnp.float32), d1)
    d6 = upsample_like(apply_conv(hx6, params['side6'], None, jnp.float32), d1)

    # outconv with the final sigmoid fused into its epilogue
    d0_sig = apply_conv(jnp.concatenate([d1, d2, d3, d4, d5, d6], -1),
                        params['outconv'], 'sigmoid', jnp.float32)
    # one lane-dense sigmoid over the six side maps
    side_sig = pallas_sigmoid(jnp.stack([d1, d2, d3, d4, d5, d6], 0))

    outs_all = (d0_sig,) + tuple(side_sig[i] for i in range(6))
    return tuple(jnp.transpose(o, (0, 3, 1, 2)) for o in outs_all)


def build_forward(params):
    """One top-level jit over the whole network.

    Params are captured in the closure so static config (dilation, L,
    is_zero) stays Python; weights become compile-time constants.  All ~120
    Pallas conv calls and their glue are dispatched as a single XLA program,
    and the (structurally dead) control branch is removed by DCE.
    """
    return jax.jit(functools.partial(control_u2netp_forward, params))


# -----------------------------------------------------------------------------
if __name__ == "__main__":
    key = jax.random.PRNGKey(0)
    params = make_params(key, in_ch=3, out_ch=1)
    forward = build_forward(params)

    kx, ks = jax.random.split(jax.random.fold_in(key, 12345))
    N, C, H, W = 2, 3, 16, 16
    x = jax.random.normal(kx, (N, C, H, W), jnp.float32)
    seg = jax.random.normal(ks, (N, C, H, W), jnp.float32)

    outputs = forward(x, seg)
    outputs = jax.block_until_ready(outputs)

    assert len(outputs) == 7
    for o in outputs:
        assert o.shape == (N, 1, H, W), o.shape
        assert bool(jnp.all(jnp.isfinite(o)))
        assert bool(jnp.all((o >= 0.0) & (o <= 1.0)))

    print("KERNEL_OK")
</pallas_src>

<mosaic_0001>
module attributes {stable_mosaic.version = 11 : i64} {
  func.func @_conv_kernel(%arg0: i32, %arg1: memref<1x18x18x3xbf16, #tpu.memory_space<vmem>>, %arg2: memref<27x64xbf16, #tpu.memory_space<vmem>>, %arg3: memref<1x64xf32, #tpu.memory_space<vmem>>, %arg4: memref<1x64xf32, #tpu.memory_space<vmem>>, %arg5: memref<1x256x64xbf16, #tpu.memory_space<vmem>>) attributes {dimension_semantics = [#tpu.dimension_semantics<parallel>], iteration_bounds = array<i64: 2>, scalar_prefetch = 0 : i64, scratch_operands = 0 : i64, tpu.core_type = #tpu.core_type<tc>, window_params = [{transform_indices = @transform_0, window_bounds = array<i64: 1, 18, 18, 3>}, {pipeline_mode = #tpu.pipeline_mode<synchronous>, transform_indices = @transform_1, window_bounds = array<i64: 27, 64>}, {pipeline_mode = #tpu.pipeline_mode<synchronous>, transform_indices = @transform_2, window_bounds = array<i64: 1, 64>}, {pipeline_mode = #tpu.pipeline_mode<synchronous>, transform_indices = @transform_3, window_bounds = array<i64: 1, 64>}, {transform_indices = @transform_4, window_bounds = array<i64: 1, 256, 64>}]} {
    %c0 = arith.constant 0 : index
    %c0_0 = arith.constant 0 : index
    %c0_1 = arith.constant 0 : index
    %c0_2 = arith.constant 0 : index
    %0 = vector.load %arg1[%c0, %c0_0, %c0_1, %c0_2] : memref<1x18x18x3xbf16, #tpu.memory_space<vmem>>, vector<1x16x16x3xbf16>
    %1 = vector.shape_cast %0 : vector<1x16x16x3xbf16> to vector<16x16x3xbf16>
    %c0_3 = arith.constant 0 : index
    %c0_4 = arith.constant 0 : index
    %c1 = arith.constant 1 : index
    %c0_5 = arith.constant 0 : index
    %2 = vector.load %arg1[%c0_3, %c0_4, %c1, %c0_5] : memref<1x18x18x3xbf16, #tpu.memory_space<vmem>>, vector<1x16x16x3xbf16>
    %3 = vector.shape_cast %2 : vector<1x16x16x3xbf16> to vector<16x16x3xbf16>
    %c0_6 = arith.constant 0 : index
    %c0_7 = arith.constant 0 : index
    %c2 = arith.constant 2 : index
    %c0_8 = arith.constant 0 : index
    %4 = vector.load %arg1[%c0_6, %c0_7, %c2, %c0_8] : memref<1x18x18x3xbf16, #tpu.memory_space<vmem>>, vector<1x16x16x3xbf16>
    %5 = vector.shape_cast %4 : vector<1x16x16x3xbf16> to vector<16x16x3xbf16>
    %c0_9 = arith.constant 0 : index
    %c1_10 = arith.constant 1 : index
    %c0_11 = arith.constant 0 : index
    %c0_12 = arith.constant 0 : index
    %6 = vector.load %arg1[%c0_9, %c1_10, %c0_11, %c0_12] : memref<1x18x18x3xbf16, #tpu.memory_space<vmem>>, vector<1x16x16x3xbf16>
    %7 = vector.shape_cast %6 : vector<1x16x16x3xbf16> to vector<16x16x3xbf16>
    %c0_13 = arith.constant 0 : index
    %c1_14 = arith.constant 1 : index
    %c1_15 = arith.constant 1 : index
    %c0_16 = arith.constant 0 : index
    %8 = vector.load %arg1[%c0_13, %c1_14, %c1_15, %c0_16] : memref<1x18x18x3xbf16, #tpu.memory_space<vmem>>, vector<1x16x16x3xbf16>
    %9 = vector.shape_cast %8 : vector<1x16x16x3xbf16> to vector<16x16x3xbf16>
    %c0_17 = arith.constant 0 : index
    %c1_18 = arith.constant 1 : index
    %c2_19 = arith.constant 2 : index
    %c0_20 = arith.constant 0 : index
    %10 = vector.load %arg1[%c0_17, %c1_18, %c2_19, %c0_20] : memref<1x18x18x3xbf16, #tpu.memory_space<vmem>>, vector<1x16x16x3xbf16>
    %11 = vector.shape_cast %10 : vector<1x16x16x3xbf16> to vector<16x16x3xbf16>
    %c0_21 = arith.constant 0 : index
    %c2_22 = arith.constant 2 : index
    %c0_23 = arith.constant 0 : index
    %c0_24 = arith.constant 0 : index
    %12 = vector.load %arg1[%c0_21, %c2_22, %c0_23, %c0_24] : memref<1x18x18x3xbf16, #tpu.memory_space<vmem>>, vector<1x16x16x3xbf16>
    %13 = vector.shape_cast %12 : vector<1x16x16x3xbf16> to vector<16x16x3xbf16>
    %c0_25 = arith.constant 0 : index
    %c2_26 = arith.constant 2 : index
    %c1_27 = arith.constant 1 : index
    %c0_28 = arith.constant 0 : index
    %14 = vector.load %arg1[%c0_25, %c2_26, %c1_27, %c0_28] : memref<1x18x18x3xbf16, #tpu.memory_space<vmem>>, vector<1x16x16x3xbf16>
    %15 = vector.shape_cast %14 : vector<1x16x16x3xbf16> to vector<16x16x3xbf16>
    %c0_29 = arith.constant 0 : index
    %c2_30 = arith.constant 2 : index
    %c2_31 = arith.constant 2 : index
    %c0_32 = arith.constant 0 : index
    %16 = vector.load %arg1[%c0_29, %c2_30, %c2_31, %c0_32] : memref<1x18x18x3xbf16, #tpu.memory_space<vmem>>, vector<1x16x16x3xbf16>
    %17 = vector.shape_cast %16 : vector<1x16x16x3xbf16> to vector<16x16x3xbf16>
    %18 = tpu.concatenate %1, %3, %5, %7, %9, %11, %13, %15, %17 in 2 : vector<16x16x3xbf16>, vector<16x16x3xbf16>, vector<16x16x3xbf16>, vector<16x16x3xbf16>, vector<16x16x3xbf16>, vector<16x16x3xbf16>, vector<16x16x3xbf16>, vector<16x16x3xbf16>, vector<16x16x3xbf16> -> vector<16x16x27xbf16>
    %19 = vector.shape_cast %18 : vector<16x16x27xbf16> to vector<256x27xbf16>
    %c0_33 = arith.constant 0 : index
    %c0_34 = arith.constant 0 : index
    %20 = vector.load %arg2[%c0_33, %c0_34] : memref<27x64xbf16, #tpu.memory_space<vmem>>, vector<27x64xbf16>
    %cst = arith.constant dense<0.000000e+00> : vector<256x64xf32>
    %21 = tpu.matmul %19, %20, %cst {dimension_numbers = #tpu.dot_dimension_numbers<[1], [0], [0], [1], [0, 0, 1, 1], [], []>} : vector<256x27xbf16>, vector<27x64xbf16>, vector<256x64xf32> -> vector<256x64xf32>
    %c0_35 = arith.constant 0 : index
    %c0_36 = arith.constant 0 : index
    %22 = vector.load %arg3[%c0_35, %c0_36] : memref<1x64xf32, #tpu.memory_space<vmem>>, vector<1x64xf32>
    %23 = vector.broadcast %22 : vector<1x64xf32> to vector<256x64xf32>
    %24 = arith.mulf %21, %23 : vector<256x64xf32>
    %c0_37 = arith.constant 0 : index
    %c0_38 = arith.constant 0 : index
    %25 = vector.load %arg4[%c0_37, %c0_38] : memref<1x64xf32, #tpu.memory_space<vmem>>, vector<1x64xf32>
    %26 = vector.broadcast %25 : vector<1x64xf32> to vector<256x64xf32>
    %27 = arith.addf %24, %26 : vector<256x64xf32>
    %cst_39 = arith.constant 0.000000e+00 : f32
    %28 = vector.broadcast %cst_39 : f32 to vector<256x64xf32>
    %29 = arith.maximumf %27, %28 : vector<256x64xf32>
    %30 = arith.truncf %29 : vector<256x64xf32> to vector<256x64xbf16>
    %c0_40 = arith.constant 0 : index
    %c0_41 = arith.constant 0 : index
    %c0_42 = arith.constant 0 : index
    %31 = vector.load %arg5[%c0_40, %c0_41, %c0_42] : memref<1x256x64xbf16, #tpu.memory_space<vmem>>, vector<1x256x64xbf16>
    %32 = vector.shape_cast %31 : vector<1x256x64xbf16> to vector<256x64xbf16>
    %33 = vector.shape_cast %30 : vector<256x64xbf16> to vector<1x256x64xbf16>
    tpu.vector_store %arg5[%c0_40, %c0_41, %c0_42], %33 {strides = array<i32>} : memref<1x256x64xbf16, #tpu.memory_space<vmem>>, vector<1x256x64xbf16>,
    return
  }
  func.func @transform_0(%arg0: i32) -> (i32, i32, i32, i32) {
    %c0_i32 = arith.constant 0 : i32
    %c0_i32_0 = arith.constant 0 : i32
    %c0_i32_1 = arith.constant 0 : i32
    %c0_i32_2 = arith.constant 0 : i32
    return %arg0, %c0_i32, %c0_i32_0, %c0_i32_1 : i32, i32, i32, i32
  }
  func.func @transform_1(%arg0: i32) -> (i32, i32) {
    %c0_i32 = arith.constant 0 : i32
    %c0_i32_0 = arith.constant 0 : i32
    %c0_i32_1 = arith.constant 0 : i32
    return %c0_i32, %c0_i32_0 : i32, i32
  }
  func.func @transform_2(%arg0: i32) -> (i32, i32) {
    %c0_i32 = arith.constant 0 : i32
    %c0_i32_0 = arith.constant 0 : i32
    %c0_i32_1 = arith.constant 0 : i32
    return %c0_i32, %c0_i32_0 : i32, i32
  }
  func.func @transform_3(%arg0: i32) -> (i32, i32) {
    %c0_i32 = arith.constant 0 : i32
    %c0_i32_0 = arith.constant 0 : i32
    %c0_i32_1 = arith.constant 0 : i32
    return %c0_i32, %c0_i32_0 : i32, i32
  }
  func.func @transform_4(%arg0: i32) -> (i32, i32, i32) {
    %c0_i32 = arith.constant 0 : i32
    %c0_i32_0 = arith.constant 0 : i32
    %c0_i32_1 = arith.constant 0 : i32
    return %arg0, %c0_i32, %c0_i32_0 : i32, i32, i32
  }
}

</mosaic_0001>

<bundles_post_ra>
// kernel: fn.1
= control target key start
LH: loop header
LB: loop body
LE: loop exit
PB: predicated region body
PF: predicated region fallthrough
CT: control target
= control target key end

     0   :  { %9 = vsyncpa [#allocation3], 0  ;;  %s4906_s0 = inlined_call_operand.vmem [shape: bf16[2,18,18,3], index: 0, kind: input, shape index: {}]   ;;  %s4907_s1 = inlined_call_operand.vmem [shape: bf16[27,64], index: 1, kind: input, shape index: {}]   ;;  %s4908_s2 = inlined_call_operand.vmem [shape: f32[1,64], index: 2, kind: input, shape index: {}]   ;;  %s4909_s3 = inlined_call_operand.vmem [shape: f32[1,64], index: 3, kind: input, shape index: {}]   ;;  %s4910_s4 = inlined_call_operand.hbm [shape: bf16[2,256,64], index: 4, kind: output, shape index: {}]  }
   0x1   :  { %11 = vsyncpa [#allocation3 + $0x1], 0  ;;  %s3448_s15 = smov 0   ;;  %s3450_s16 = smov 0  }
   0x2   :  { %s3452_s17 = smov 0   ;;  %s3454_s18 = smov 0  }
   0x3 LB: > { %s3469_s19 = sadd.s32 4294967295, %s3409_s18   ;;  %s2724_s20 = sadd.s32 4294967294, %s3409_s18   ;;  %s3409_s18 = sphi %s3454_s18, %s4934_s18   ;;  %s3405_s17 = sphi %s3452_s17, %s4933_s17   ;;  %s3401_s16 = sphi %s3450_s16, %s4932_s16   ;;  %s3397_s15 = sphi %s3448_s15, %s4931_s15  }
   0x4   : > { %s3473_s21 = sadd.s32 1, %s3409_s18   ;;  %s113_s22 = sadd.s32 1, %s3405_s17 }
   0x5   : > { %s110_s23 = ssub.s32 %s3409_s18, %s3473_s21  ;;  %p123_p0 = scmp.ne.s32.totalorder %s3405_s17, %s3401_s16 }
   0x6   : > { %p111_p1 = scmp.eq.s32.totalorder %s110_s23, 0  ;;  %p124_p2 = scmp.eq.s32.totalorder %s3469_s19, 1 }
   0x7   : > { %p129_p3 = scmp.ne.s32.totalorder %s3401_s16, %s3397_s15  ;;  %p130_p4 = scmp.eq.s32.totalorder %s2724_s20, 1 }
   0x8   : > { %s3484_s24 = scalar_select %p111_p1, %s3405_s17, %s113_s22  }
   0x9   : > { %p3486_p5 = por %p124_p2, %p123_p0  ;;  %p3490_p6 = por %p130_p4, %p129_p3 }
   0xa   : > { %p2727_p7 = scmp.ge.s32.totalorder %s3409_s18, 1  ;;  %p165_p8 = scmp.lt.s32.totalorder %s3409_s18, 3 }
   0xc   : > { %p166_p9 = pnand %p2727_p7, %p165_p8 }
   0xe   : > { %169 = sbr.rel (%p166_p9) target bundleno = 640 (0x280), region = 36 }
  0x15   : > { %p191_p10 = scmp.lt.s32.totalorder %s3469_s19, 1  ;;  %s3411_s6 = smov 9   ;;  %vm792_vm0 = vcmask 1046528   ;;  %vm519_vm1 = vsmask.f32 7424  ;;  %vm2209_vm2 = vcmask 1044480  }
  0x16   : > { %s3412_s7 = smov 6   ;;  %s3413_s8 = smov 3   ;;  %vm2210_vm3 = vcmask 1045504   ;;  %vm1897_vm4 = vcmask 23552   ;;  %vm1930_vm5 = vcmask 48128   ;;  %vm1963_vm6 = vcmask 72704  }
  0x17   : > { %s192_s27 = scalar_select %p191_p10, %s3469_s19, 1  ;;  %vm1996_vm7 = vcmask 97280   ;;  %vm2029_vm8 = vcmask 121856   ;;  %vm2062_vm9 = vcmask 146432   ;;  %vm2095_vm10 = vcmask 171008  }
  0x18   : > { %s3414_s9 = smov 12   ;;  %s3415_s10 = smov 15   ;;  %vm2128_vm11 = vcmask 195584   ;;  %vm2176_vm12 = vcmask 220160   ;;  %vm2615_vm13 = vcmask 519168  }
  0x19   : > { %s3150_s28 = smul.u32 216, %s192_s27  ;;  %s3416_s11 = smov 18  }
  0x1a   : > { %s3417_s14 = smov 21   ;;  %s3418_s20 = smov 24  }
  0x1b   : > { %s3501_s5 = scalar_lea.vmem %s4906_s0, %s3150_s28  ;;  %s188_s29 = sand.u32 1, %s3401_s16  }
  0x1c   : > { %v2746_v0 = vld [vmem:[%s3501_s5 + $0x6c] sm:$0xf]  ;;  %v3505_v1 = vld [vmem:[%s3501_s5 + $0x70] sm:$0xf]  ;;  %v214_v6 = vld [vmem:[%s3501_s5 + $0x64] sm:$0xf] }
  0x1d   : > { %v3508_v2 = vcombine.low %v2746_v0, %v3505_v1  ;;  %v2730_v3 = vld [vmem:[%s3501_s5 + $0xc] sm:$0xf]  ;;  %v3512_v4 = vld [vmem:[%s3501_s5 + $0x10] sm:$0xf]  ;;  %v253_v7 = vld [vmem:[%s3501_s5 + $0x60] sm:$0xe] }
  0x1e   : > { %v3515_v5 = vcombine.low %v2730_v3, %v3512_v4  ;;  %v3522_v8 = vld [vmem:[%s3501_s5 + $0x68] ss:$0 sps:$4 sm:$0x11]   ;;  %v2898_v9 = vcombine.low %v253_v7, %v214_v6  ;;  %v213_v10 = vld [vmem:[%s3501_s5 + $0x60] sm:$0xf]  ;;  %s4865_s12 = scalar_lea.sflag [#allocation3], %s188_s29 }
  0x1f   : > { %969 = vrot.lane.b32.xlu1 %v3508_v2, %s3411_s6  ;;  %v1132_v11 = vshll.u32 %v3508_v2, 16  ;;  %v198_v12 = vld [vmem:[%s3501_s5 + $0x4] sm:$0xf]  ;;  %v818_v14 = vrot.slane %v3522_v8, 1  ;;  %v245_v15 = vld [vmem:[%s3501_s5] sm:$0xe]  ;;  %v3533_v18 = vcombine.low %v213_v10, %v214_v6 }
  0x20   : > { %953 = vrot.lane.b32.xlu0 %v3515_v5, %s3411_s6  ;;  %v817_v13 = vrot.slane %v2898_v9, 1  ;;  %v197_v16 = vld [vmem:[%s3501_s5] sm:$0xf]  ;;  %v1036_v17 = vshll.u32 %v3515_v5, 16  ;;  %v2890_v20 = vcombine.low %v245_v15, %v198_v12  ;;  %v215_v21 = vld [vmem:[%s3501_s5 + $0x6c] sm:$0xf] }
  0x21   : > { %v3208_v19 = vld [vmem:[%s3501_s5 + $0x8] ss:$0 sps:$4 sm:$0x11]   ;;  %v3538_v23 = vcombine.low %v197_v16, %v198_v12  ;;  %v216_v24 = vld [vmem:[%s3501_s5 + $0x70] sm:$0xf]  ;;  %v617_v30 = vshrl.u32 %v3533_v18, 16 }
  0x22   : > { %v819_v22 = vsel %vm792_vm0, %v817_v13, %v818_v14  ;;  %v254_v25 = vld [vmem:[%s3501_s5 + $0x6c] sm:$0xe]  ;;  %v793_v26 = vrot.slane %v2890_v20, 1  ;;  %v794_v27 = vrot.slane %v3208_v19, 1  ;;  %v3545_v31 = vcombine.low %v215_v21, %v216_v24  ;;  %v200_v33 = vld [vmem:[%s3501_s5 + $0x10] sm:$0xf] }
  0x23   : > { %857 = vrot.lane.b32.xlu1 %v819_v22, %s3412_s7  ;;  %v3212_v28 = vld [vmem:[%s3501_s5 + $0x74] ss:$0 sps:$4 sm:$0x11]   ;;  %v2899_v29 = vcombine.low %v254_v25, %v216_v24  ;;  %v199_v32 = vld [vmem:[%s3501_s5 + $0xc] sm:$0xf]  ;;  %v521_v41 = vshrl.u32 %v3538_v23, 16 }
  0x24   : > { %v795_v34 = vsel %vm792_vm0, %v793_v26, %v794_v27  ;;  %v821_v36 = vrot.slane %v3212_v28, 1  ;;  %v246_v37 = vld [vmem:[%s3501_s5 + $0xc] sm:$0xe]  ;;  %v3551_v38 = vcombine.low %v199_v32, %v200_v33  ;;  %v3215_v39 = vld [vmem:[%s3501_s5 + $0x14] ss:$0 sps:$4 sm:$0x11]  }
  0x25   : > { %v820_v35 = vrot.slane %v2899_v29, 1  ;;  %841 = vrot.lane.b32.xlu0 %v795_v34, %s3412_s7  ;;  %v2891_v40 = vcombine.low %v246_v37, %v200_v33  ;;  %v523_v42 = vshll.u32 %v3538_v23, 16  ;;  %v528_v43 = vshll.u32 %v3208_v19, 16  ;;  %v2748_v52 = vld [vmem:[%s3501_s5 + $0x78] sm:$0xf] }
  0x26   : > { %v533_v45 = vshrl.u32 %v3551_v38, 16  ;;  %v535_v46 = vshll.u32 %v3551_v38, 16  ;;  %v629_v47 = vshrl.u32 %v3545_v31, 16  ;;  %v797_v49 = vrot.slane %v3215_v39, 1  ;;  %v3565_v57 = vld [vmem:[%s3501_s5 + $0x7c] sm:$0xf] }
  0x27   : > { %v822_v44 = vsel %vm792_vm0, %v820_v35, %v821_v36  ;;  %v796_v48 = vrot.slane %v2891_v40, 1  ;;  %v540_v50 = vshll.u32 %v3215_v39, 16  ;;  %v525_v51 = vrot.slane %v523_v42, 1  ;;  %v2732_v62 = vld [vmem:[%s3501_s5 + $0x18] sm:$0xf] }
  0x28   : > { %859 = vrot.lane.b32.xlu1 %v822_v44, %s3412_s7  ;;  %v537_v53 = vrot.slane %v535_v46, 1  ;;  %v530_v54 = vrot.slane %v528_v43, 1  ;;  %v631_v55 = vshll.u32 %v3545_v31, 16  ;;  %v636_v56 = vshll.u32 %v3212_v28, 16  ;;  %v3571_v63 = vld [vmem:[%s3501_s5 + $0x1c] sm:$0xf] }
  0x29   : > { %v798_v58 = vsel %vm792_vm0, %v796_v48, %v797_v49  ;;  %v542_v59 = vrot.slane %v540_v50, 1  ;;  %v526_v60 = vor.u32 %v525_v51, %v521_v41  ;;  %v619_v61 = vshll.u32 %v3533_v18, 16  ;;  %v3578_v13 = vld [vmem:[%s3501_s5 + $0x74] ss:$0 sps:$4 sm:$0x11]  }
  0x2a   : > { %843 = vrot.lane.b32.xlu0 %v798_v58, %s3412_s7  ;;  %v538_v0 = vor.u32 %v537_v53, %v533_v45  ;;  %v633_v3 = vrot.slane %v631_v55, 1  ;;  %v638_v6 = vrot.slane %v636_v56, 1  ;;  %v624_v7 = vshll.u32 %v3522_v8, 16  ;;  %v3583_v20 = vld [vmem:[%s3501_s5 + $0x14] ss:$0 sps:$4 sm:$0x11]  }
  0x2b   : > { %v531_v9 = vsel %vm519_vm1, %v526_v60, %v530_v54  ;;  %v621_v10 = vrot.slane %v619_v61, 1  ;;  %v2915_v12 = vcombine.low %v2748_v52, %v3565_v57  ;;  %v2907_v19 = vcombine.low %v2732_v62, %v3571_v63  ;;  %v3590_v24 = vld [vmem:[%s3501_s5 + $0x80] ss:$0 sps:$4 sm:$0x11]   ;;  %v2786_v35 = vld [vmem:[%s3501_s5 + $0x6c] sm:$0xe] }
  0x2c   : > { %v543_v14 = vsel %vm519_vm1, %v538_v0, %v542_v59  ;;  %v634_v15 = vor.u32 %v633_v3, %v629_v47  ;;  %v626_v16 = vrot.slane %v624_v7, 1  ;;  %v1130_v21 = vshrl.u32 %v3508_v2, 16  ;;  %v2778_v43 = vld [vmem:[%s3501_s5 + $0xc] sm:$0xe]  ;;  %v2787_v45 = vld [vmem:[%s3501_s5 + $0x78] sm:$0xe] }
  0x2d   : > { %714 = vrot.lane.b32.xlu1 %v543_v14, %s3413_s8  ;;  %v622_v8 = vor.u32 %v621_v10, %v617_v30  ;;  %v1134_v22 = vrot.slane %v1132_v11, 1  ;;  %v1144_v26 = vshll.u32 %v2915_v12, 16  ;;  %v1137_v27 = vshll.u32 %v3578_v13, 16  ;;  %v3601_v11 = vld [vmem:[%s3501_s5 + $0x20] ss:$0 sps:$4 sm:$0x11]  }
  0x2e   : > { %712 = vrot.lane.b32.xlu0 %v531_v9, %s3413_s8  ;;  %v639_v25 = vsel %vm519_vm1, %v634_v15, %v638_v6  ;;  %v1034_v28 = vshrl.u32 %v3515_v5, 16  ;;  %v1048_v30 = vshll.u32 %v2907_v19, 16  ;;  %v1038_v32 = vrot.slane %v1036_v17, 1  ;;  %v2779_v50 = vld [vmem:[%s3501_s5 + $0x18] sm:$0xe] }
  0x2f   : > { %v627_v29 = vsel %vm519_vm1, %v622_v8, %v626_v16  ;;  %v1041_v2 = vshll.u32 %v3583_v20, 16  ;;  %v1135_v33 = vor.u32 %v1134_v22, %v1130_v21  ;;  %v1139_v34 = vrot.slane %v1137_v27, 1  ;;  %v2810_v55 = vld [vmem:[%s3501_s5 + $0x78] sm:$0xf]  ;;  %v3621_v56 = vld [vmem:[%s3501_s5 + $0x7c] sm:$0xf] }
  0x30   : > { %v1039_v36 = vor.u32 %v1038_v32, %v1034_v28  ;;  %v1142_v37 = vshrl.u32 %v2915_v12, 16  ;;  %v1146_v39 = vrot.slane %v1144_v26, 1  ;;  %v1149_v5 = vshll.u32 %v3590_v24, 16  ;;  %v2794_v3 = vld [vmem:[%s3501_s5 + $0x18] sm:$0xf] }
  0x31   : > { %730 = vrot.lane.b32.xlu1 %v639_v25, %s3413_s8  ;;  %v1043_v17 = vrot.slane %v1041_v2, 1  ;;  %v1046_v40 = vshrl.u32 %v2907_v19, 16  ;;  %v1050_v41 = vrot.slane %v1048_v30, 1  ;;  %v1053_v42 = vshll.u32 %v3601_v11, 16  ;;  %v3632_v6 = vld [vmem:[%s3501_s5 + $0x1c] sm:$0xf] }
  0x32   : > { %728 = vrot.lane.b32.xlu0 %v627_v29, %s3413_s8  ;;  %v2946_v44 = vcombine.low %v2786_v35, %v3505_v1  ;;  %v1140_v46 = vsel %vm519_vm1, %v1135_v33, %v1139_v34  ;;  %v1147_v47 = vor.u32 %v1146_v39, %v1142_v37  ;;  %v1151_v48 = vrot.slane %v1149_v5, 1  ;;  %v2796_v16 = vld [vmem:[%s3501_s5 + $0x24] sm:$0xf]  ;;  %v3652_v21 = vld [vmem:[%s3501_s5 + $0x80] ss:$0 sps:$4 sm:$0x11]  }
  0x33   : > { %v2938_v49 = vcombine.low %v2778_v43, %v3512_v4  ;;  %v1044_v51 = vsel %vm519_vm1, %v1039_v36, %v1043_v17  ;;  %v1051_v52 = vor.u32 %v1050_v41, %v1046_v40  ;;  %v1055_v53 = vrot.slane %v1053_v42, 1  ;;  %v3659_v27 = vld [vmem:[%s3501_s5 + $0x20] ss:$0 sps:$4 sm:$0x11]   ;;  %v217_v37 = vld [vmem:[%s3501_s5 + $0x78] sm:$0xf] }
  0x34   : > { %v1329_v1 = vrot.slane %v2946_v44, 1  ;;  %v1330_v54 = vrot.slane %v3578_v13, 1  ;;  %v2947_v58 = vcombine.low %v2787_v45, %v3565_v57  ;;  %v2939_v4 = vcombine.low %v2779_v50, %v3571_v63  ;;  %v2812_v63 = vld [vmem:[%s3501_s5 + $0x84] sm:$0xf]  ;;  %v3641_v13 = vld [vmem:[%s3501_s5 + $0x88] sm:$0xf] }
  0x35   : > { %971 = vrot.lane.b32.xlu1 %v2915_v12, %s3411_s6  ;;  %v1152_v59 = vsel %vm519_vm1, %v1147_v47, %v1151_v48  ;;  %v1056_v60 = vsel %vm519_vm1, %v1051_v52, %v1055_v53  ;;  %v1305_v61 = vrot.slane %v2938_v49, 1  ;;  %v1306_v62 = vrot.slane %v3583_v20, 1  ;;  %v3668_v34 = vld [vmem:[%s3501_s5 + $0x2c] ss:$0 sps:$4 sm:$0x11]  }
  0x36   : > { %955 = vrot.lane.b32.xlu0 %v2907_v19, %s3411_s6  ;;  %v2962_v0 = vcombine.low %v2810_v55, %v3621_v56  ;;  %v1331_v57 = vsel %vm792_vm0, %v1329_v1, %v1330_v54  ;;  %v1332_v7 = vrot.slane %v2947_v58, 1  ;;  %v1333_v9 = vrot.slane %v3590_v24, 1  ;;  %v3647_v19 = vld [vmem:[%s3501_s5 + $0x28] sm:$0xf]  ;;  %v3673_v39 = vld [vmem:[%s3501_s5 + $0x7c] sm:$0xf] }
  0x37   : > { %v1308_v10 = vrot.slane %v2939_v4, 1  ;;  %v1309_v12 = vrot.slane %v3601_v11, 1  ;;  %v1307_v14 = vsel %vm792_vm0, %v1305_v61, %v1306_v62  ;;  %v2954_v15 = vcombine.low %v2794_v3, %v3632_v6  ;;  %v3664_v11 = vld [vmem:[%s3501_s5 + $0x8c] ss:$0 sps:$4 sm:$0x11]   ;;  %v3301_v54 = vld [vmem:[%s4907_s1] sm:$0xff]  }
  0x38   : > { %v1644_v20 = vshll.u32 %v2962_v0, 16  ;;  %v2963_v8 = vcombine.low %v2812_v63, %v3641_v13  ;;  %v1334_v22 = vsel %vm792_vm0, %v1332_v7, %v1333_v9  ;;  %v2955_v24 = vcombine.low %v2796_v16, %v3647_v19  ;;  %v201_v17 = vld [vmem:[%s3501_s5 + $0x18] sm:$0xf]  ;;  %v3677_v40 = vld [vmem:[%s3501_s5 + $0x1c] sm:$0xf]  ;;  %3110 = vmatprep.subr.bf16.mxu0 %v3301_v54  ;;  %3146 = vmatprep.subr.bf16.mxu1 %v3301_v54 }
  0x39   : > { %1241 = vrot.lane.b32.xlu1 %v1140_v46, %s3414_s9  ;;  %v1310_v25 = vsel %vm792_vm0, %v1308_v10, %v1309_v12  ;;  %v1548_v26 = vshll.u32 %v2954_v15, 16  ;;  %v1642_v28 = vshrl.u32 %v2962_v0, 16  ;;  %v1649_v32 = vshll.u32 %v3652_v21, 16  ;;  %v2850_v41 = vld [vmem:[%s3501_s5 + $0x78] sm:$0xe]  ;;  %3111 = vmatpush3.bf16.msra.mxu0 %v3301_v54 }
  0x3a   : > { %1225 = vrot.lane.b32.xlu0 %v1044_v51, %s3414_s9  ;;  %v1646_v29 = vrot.slane %v1644_v20, 1  ;;  %v1656_v30 = vshll.u32 %v2963_v8, 16  ;;  %v1546_v2 = vshrl.u32 %v2954_v15, 16  ;;  %v1560_v33 = vshll.u32 %v2955_v24, 16  ;;  %v2842_v46 = vld [vmem:[%s3501_s5 + $0x18] sm:$0xe]  ;;  %3148 = vmatpush3.bf16.msra.mxu1 %v3301_v54 }
  0x3b   : > { %v1550_v35 = vrot.slane %v1548_v26, 1  ;;  %v1553_v36 = vshll.u32 %v3659_v27, 16  ;;  %v1651_v42 = vrot.slane %v1649_v32, 1  ;;  %v1654_v43 = vshrl.u32 %v2963_v8, 16  ;;  %v3710_v63 = vld [vmem:[%s3501_s5 + $0x88] sm:$0xf] }
  0x3c   : > { %v1647_v5 = vor.u32 %v1646_v29, %v1642_v28  ;;  %v1658_v44 = vrot.slane %v1656_v30, 1  ;;  %v1661_v45 = vshll.u32 %v3664_v11, 16  ;;  %v1558_v47 = vshrl.u32 %v2955_v24, 16  ;;  %v203_v10 = vld [vmem:[%s3501_s5 + $0x24] sm:$0xf] }
  0x3d   : > { %1243 = vrot.lane.b32.xlu1 %v1152_v59, %s3414_s9  ;;  %v1562_v48 = vrot.slane %v1560_v33, 1  ;;  %v1565_v49 = vshll.u32 %v3668_v34, 16  ;;  %v3686_v50 = vcombine.low %v217_v37, %v3673_v39  ;;  %v1551_v51 = vor.u32 %v1550_v35, %v1546_v2  ;;  %v3698_v59 = vld [vmem:[%s3501_s5 + $0x80] ss:$0 sps:$4 sm:$0x11]  }
  0x3e   : > { %1227 = vrot.lane.b32.xlu0 %v1056_v60, %s3414_s9  ;;  %v1555_v52 = vrot.slane %v1553_v36, 1  ;;  %v3689_v53 = vcombine.low %v201_v17, %v3677_v40  ;;  %v2994_v1 = vcombine.low %v2850_v41, %v3621_v56  ;;  %v2986_v55 = vcombine.low %v2842_v46, %v3632_v6  ;;  %v3715_v12 = vld [vmem:[%s3501_s5 + $0x28] sm:$0xf]  ;;  %v3740_v37 = vld [vmem:[%s3501_s5 + $0x8c] ss:$0 sps:$4 sm:$0x11]  }
  0x3f   : > { %v1659_v58 = vor.u32 %v1658_v44, %v1654_v43  ;;  %v1663_v4 = vrot.slane %v1661_v45, 1  ;;  %v1652_v56 = vsel %vm519_vm1, %v1647_v5, %v1651_v42  ;;  %v1563_v60 = vor.u32 %v1562_v48, %v1558_v47 }
  0x40   : > { %v1567_v61 = vrot.slane %v1565_v49, 1  ;;  %v643_v62 = vshll.u32 %v3686_v50, 16  ;;  %v1556_v3 = vsel %vm519_vm1, %v1551_v51, %v1555_v52  ;;  %v547_v6 = vshll.u32 %v3689_v53, 16  ;;  %v255_v52 = vld [vmem:[%s3501_s5 + $0x78] sm:$0xe] }
  0x41   : > { %1369 = vrot.lane.b32.xlu1 %v1331_v57, %s3415_s10  ;;  %v219_v57 = vld [vmem:[%s3501_s5 + $0x84] sm:$0xf]  ;;  %v1841_v7 = vrot.slane %v2994_v1, 1  ;;  %v1842_v9 = vrot.slane %v3652_v21, 1  ;;  %v1817_v16 = vrot.slane %v2986_v55, 1  ;;  %v1818_v20 = vrot.slane %v3659_v27, 1 }
  0x42   : > { %1353 = vrot.lane.b32.xlu0 %v1307_v14, %s3415_s10  ;;  %v2851_v14 = vld [vmem:[%s3501_s5 + $0x84] sm:$0xe]  ;;  %v1568_v21 = vsel %vm519_vm1, %v1563_v60, %v1567_v61  ;;  %v3727_v26 = vcombine.low %v219_v57, %v3710_v63  ;;  %v545_v28 = vshrl.u32 %v3689_v53, 16  ;;  %v549_v29 = vrot.slane %v547_v6, 1 }
  0x43   : > { %v3732_v30 = vcombine.low %v203_v10, %v3715_v12  ;;  %v2995_v32 = vcombine.low %v2851_v14, %v3641_v13  ;;  %v1843_v35 = vsel %vm792_vm0, %v1841_v7, %v1842_v9  ;;  %v1819_v17 = vsel %vm792_vm0, %v1817_v16, %v1818_v20  ;;  %v3745_v13 = vld [vmem:[%s3501_s5 + $0x2c] ss:$0 sps:$4 sm:$0x11]   ;;  %v248_v7 = vld [vmem:[%s3501_s5 + $0x24] sm:$0xe] }
  0x44   : > { %4919 = vst [vmem:[#allocation5_spill] sm:$0xff] %v3727_v26  ;;  %v655_v5 = vshll.u32 %v3727_v26, 16  ;;  %v550_v41 = vor.u32 %v549_v29, %v545_v28  ;;  %v1845_v44 = vrot.slane %v3664_v11, 1  ;;  %v1821_v46 = vrot.slane %v3668_v34, 1  ;;  %v247_v34 = vld [vmem:[%s3501_s5 + $0x18] sm:$0xe] }
  0x45   : > { %1371 = vrot.lane.b32.xlu1 %v1334_v22, %s3415_s10  ;;  %v2843_v22 = vld [vmem:[%s3501_s5 + $0x24] sm:$0xe]  ;;  %4920 = vst [vmem:[#allocation6_spill] sm:$0xff] %v3732_v30  ;;  %v1844_v43 = vrot.slane %v2995_v32, 1  ;;  %v653_v48 = vshrl.u32 %v3727_v26, 16  ;;  %v660_v51 = vshll.u32 %v3740_v37, 16  ;;  %v2900_v60 = vcombine.low %v255_v52, %v3673_v39 }
  0x46   : > { %1355 = vrot.lane.b32.xlu0 %v1310_v25, %s3415_s10  ;;  %v645_v25 = vrot.slane %v643_v62, 1  ;;  %v2987_v2 = vcombine.low %v2843_v22, %v3647_v19  ;;  %v559_v19 = vshll.u32 %v3732_v30, 16  ;;  %v657_v49 = vrot.slane %v655_v5, 1  ;;  %v256_v62 = vld [vmem:[%s3501_s5 + $0x84] sm:$0xe] }
  0x47   : > { %v557_v54 = vshrl.u32 %v3732_v30, 16  ;;  %v564_v55 = vshll.u32 %v3745_v13, 16  ;;  %v2892_v61 = vcombine.low %v247_v34, %v3677_v40  ;;  %v824_v9 = vrot.slane %v3698_v59, 1  ;;  %v2750_v16 = vld [vmem:[%s3501_s5 + $0x84] sm:$0xf] }
  0x48   : > { %v1820_v45 = vrot.slane %v2987_v2, 1  ;;  %v561_v11 = vrot.slane %v559_v19, 1  ;;  %v2901_v14 = vcombine.low %v256_v62, %v3710_v63  ;;  %v823_v40 = vrot.slane %v2900_v60, 1  ;;  %v3776_v20 = vld [vmem:[%s3501_s5 + $0x88] sm:$0xf] }
  0x49   : > { %1481 = vrot.lane.b32.xlu1 %v2962_v0, %s3416_s11  ;;  %v3704_v0 = vld [vmem:[%s3501_s5 + $0x20] ss:$0 sps:$4 sm:$0x11]   ;;  %v566_v57 = vrot.slane %v564_v55, 1  ;;  %v3782_v22 = vld [vmem:[%s3501_s5 + $0x28] sm:$0xf] }
  0x4a   : > { %1465 = vrot.lane.b32.xlu0 %v2954_v15, %s3416_s11  ;;  %v1664_v15 = vsel %vm519_vm1, %v1659_v58, %v1663_v4  ;;  %v552_v27 = vshll.u32 %v3704_v0, 16  ;;  %v1846_v58 = vsel %vm792_vm0, %v1844_v43, %v1845_v44  ;;  %v658_v4 = vor.u32 %v657_v49, %v653_v48  ;;  %v2752_v29 = vld [vmem:[%s3501_s5 + $0x90] sm:$0xf]  ;;  %v3810_v19 = vld [vmem:[%s3501_s5 + $0x2c] ss:$0 sps:$4 sm:$0x11]  }
  0x4b   : > { %v562_v6 = vor.u32 %v561_v11, %v557_v54  ;;  %v800_v10 = vrot.slane %v3704_v0, 1  ;;  %v2734_v0 = vld [vmem:[%s3501_s5 + $0x24] sm:$0xf]  ;;  %v826_v63 = vrot.slane %v2901_v14, 1  ;;  %v803_v2 = vrot.slane %v3745_v13, 1 }
  0x4c   : > { %v554_v42 = vrot.slane %v552_v27, 1  ;;  %v2908_v28 = vcombine.low %v2734_v0, %v3782_v22  ;;  %v1065_v52 = vshll.u32 %v3810_v19, 16  ;;  %v2788_v54 = vld [vmem:[%s3501_s5 + $0x84] sm:$0xe]  ;;  %v2814_v0 = vld [vmem:[%s3501_s5 + $0x90] sm:$0xf] }
  0x4d   : > { %1483 = vrot.lane.b32.xlu1 %v2963_v8, %s3416_s11  ;;  %v648_v8 = vshll.u32 %v3698_v59, 16  ;;  %v2893_v59 = vcombine.low %v248_v7, %v3715_v12  ;;  %v3792_v12 = vld [vmem:[%s3501_s5 + $0x94] sm:$0xf]  ;;  %v2780_v34 = vld [vmem:[%s3501_s5 + $0x24] sm:$0xe] }
  0x4e   : > { %1467 = vrot.lane.b32.xlu0 %v2955_v24, %s3416_s11  ;;  %v641_v24 = vshrl.u32 %v3686_v50, 16  ;;  %v555_v1 = vsel %vm519_vm1, %v550_v41, %v554_v42  ;;  %v3806_v42 = vld [vmem:[%s3501_s5 + $0x8c] ss:$0 sps:$4 sm:$0x11]   ;;  %v2940_v7 = vcombine.low %v2780_v34, %v3782_v22  ;;  %v3839_v22 = vld [vmem:[%s3501_s5 + $0x94] sm:$0xf] }
  0x4f   : > { %v650_v33 = vrot.slane %v648_v8, 1  ;;  %v567_v8 = vsel %vm519_vm1, %v562_v6, %v566_v57  ;;  %v802_v32 = vrot.slane %v2893_v59, 1  ;;  %v1161_v48 = vshll.u32 %v3806_v42, 16  ;;  %v209_v30 = vld [vmem:[%s3501_s5 + $0x48] sm:$0xf] }
  0x50   : > { %v646_v36 = vor.u32 %v645_v25, %v641_v24  ;;  %v2916_v24 = vcombine.low %v2750_v16, %v3776_v20  ;;  %v825_v25 = vsel %vm792_vm0, %v823_v40, %v824_v9  ;;  %v2948_v57 = vcombine.low %v2788_v54, %v3776_v20  ;;  %v2789_v9 = vld [vmem:[%s3501_s5 + $0x90] sm:$0xe]  ;;  %v3880_v54 = vld [vmem:[%s3501_s5 + $0xa4] ss:$0 sps:$4 sm:$0x11]  }
  0x51   : > { %1753 = vrot.lane.b32.xlu1 %v1652_v56, %s3417_s14  ;;  %v662_v56 = vrot.slane %v660_v51, 1  ;;  %v804_v13 = vsel %vm792_vm0, %v802_v32, %v803_v2  ;;  %v3816_v51 = vld [vmem:[%s3501_s5 + $0x98] ss:$0 sps:$4 sm:$0x11]   ;;  %v2781_v40 = vld [vmem:[%s3501_s5 + $0x30] sm:$0xe] }
  0x52   : > { %1737 = vrot.lane.b32.xlu0 %v1556_v3, %s3417_s14  ;;  %v651_v47 = vsel %vm519_vm1, %v646_v36, %v650_v33  ;;  %v1822_v3 = vsel %vm792_vm0, %v1820_v45, %v1821_v46  ;;  %v2736_v33 = vld [vmem:[%s3501_s5 + $0x30] sm:$0xf]  ;;  %v1156_v36 = vshll.u32 %v2916_v24, 16  ;;  %v1154_v44 = vshrl.u32 %v2916_v24, 16  ;;  %v3852_v32 = vld [vmem:[%s3501_s5 + $0xa0] sm:$0xf] }
  0x53   : > { %v663_v39 = vsel %vm519_vm1, %v658_v4, %v662_v56  ;;  %v1058_v46 = vshrl.u32 %v2908_v28, 16  ;;  %v1173_v60 = vshll.u32 %v3816_v51, 16  ;;  %v1336_v59 = vrot.slane %v3806_v42, 1  ;;  %v4206_v26 = vld [vmem:[%s3501_s5 + $0x4c] sm:$0xf] }
  0x54   : > { %v1158_v45 = vrot.slane %v1156_v36, 1  ;;  %v3858_v36 = vld [vmem:[%s3501_s5 + $0x40] sm:$0xf] }
  0x55   : > { %1755 = vrot.lane.b32.xlu1 %v1664_v15, %s3417_s14  ;;  %v799_v15 = vrot.slane %v2892_v61, 1  ;;  %v1067_v61 = vrot.slane %v1065_v52, 1 }
  0x56   : > { %1739 = vrot.lane.b32.xlu0 %v1568_v21, %s3417_s14  ;;  %v827_v21 = vrot.slane %v3740_v37, 1  ;;  %v2917_v37 = vcombine.low %v2752_v29, %v3792_v12  ;;  %v1159_v11 = vor.u32 %v1158_v45, %v1154_v44  ;;  %v3848_v29 = vld [vmem:[%s3501_s5 + $0x34] sm:$0xf] }
  0x57   : > { %v801_v27 = vsel %vm792_vm0, %v799_v15, %v800_v10 }
  0x58   : > { %v828_v5 = vsel %vm792_vm0, %v826_v63, %v827_v21  ;;  %v1168_v43 = vshll.u32 %v2917_v37, 16  ;;  %v1166_v55 = vshrl.u32 %v2917_v37, 16  ;;  %v2949_v63 = vcombine.low %v2789_v9, %v3792_v12  ;;  %v2800_v12 = vld [vmem:[%s3501_s5 + $0x3c] sm:$0xf]  ;;  %v221_v9 = vld [vmem:[%s3501_s5 + $0x90] sm:$0xf] }
  0x59   : > { %1881 = vrot.lane.b32.xlu1 %v1843_v35, %s3418_s20  ;;  %v3798_v35 = vld [vmem:[%s3501_s5 + $0x34] sm:$0xf]  ;;  %v1311_v21 = vrot.slane %v2940_v7, 1 }
  0x5a   : > { %1865 = vrot.lane.b32.xlu0 %v1819_v17, %s3418_s20  ;;  %v1060_v17 = vshll.u32 %v2908_v28, 16  ;;  %v2909_v41 = vcombine.low %v2736_v33, %v3798_v35  ;;  %v1170_v56 = vrot.slane %v1168_v43, 1  ;;  %v2941_v2 = vcombine.low %v2781_v40, %v3798_v35  ;;  %v205_v40 = vld [vmem:[%s3501_s5 + $0x30] sm:$0xf] }
  0x5b   : > { %v1339_v35 = vrot.slane %v3816_v51, 1 }
  0x5c   : > { %v1062_v49 = vrot.slane %v1060_v17, 1  ;;  %v1070_v62 = vshrl.u32 %v2909_v41, 16  ;;  %v1171_v14 = vor.u32 %v1170_v56, %v1166_v55  ;;  %v1314_v43 = vrot.slane %v2941_v2, 1 }
  0x5d   : > { %732 = vrot.lane.b32.xlu1 %v651_v47, %s3413_s8  ;;  %v1072_v47 = vshll.u32 %v2909_v41, 16 }
  0x5e   : > { %716 = vrot.lane.b32.xlu0 %v555_v1, %s3413_s8  ;;  %v3820_v1 = vld [vmem:[%s3501_s5 + $0x38] ss:$0 sps:$4 sm:$0x11]   ;;  %v1063_v4 = vor.u32 %v1062_v49, %v1058_v46 }
  0x5f   : > { %v1077_v6 = vshll.u32 %v3820_v1, 16  ;;  %v1315_v44 = vrot.slane %v3820_v1, 1  ;;  %v3871_v46 = vld [vmem:[%s3501_s5 + $0x98] ss:$0 sps:$4 sm:$0x11]  }
  0x60   : > { %v1068_v15 = vsel %vm519_vm1, %v1063_v4, %v1067_v61  ;;  %v2852_v1 = vld [vmem:[%s3501_s5 + $0x90] sm:$0xe] }
  0x61   : > { %1883 = vrot.lane.b32.xlu1 %v1846_v58, %s3418_s20  ;;  %v1163_v58 = vrot.slane %v1161_v48, 1  ;;  %v1079_v20 = vrot.slane %v1077_v6, 1  ;;  %v3875_v48 = vld [vmem:[%s3501_s5 + $0x38] ss:$0 sps:$4 sm:$0x11]   ;;  %v1685_v6 = vshll.u32 %v3880_v54, 16 }
  0x62   : > { %1867 = vrot.lane.b32.xlu0 %v1822_v3, %s3418_s20  ;;  %v1074_v3 = vrot.slane %v1072_v47, 1 }
  0x63   : > { %v1164_v10 = vsel %vm519_vm1, %v1159_v11, %v1163_v58  ;;  %v1316_v11 = vsel %vm792_vm0, %v1314_v43, %v1315_v44  ;;  %v1673_v58 = vshll.u32 %v3871_v46, 16  ;;  %v1848_v44 = vrot.slane %v3871_v46, 1 }
  0x64   : > { %v1075_v16 = vor.u32 %v1074_v3, %v1070_v62  ;;  %v3888_v62 = vld [vmem:[%s3501_s5 + $0x44] ss:$0 sps:$4 sm:$0x11]  }
  0x65   : > { %734 = vrot.lane.b32.xlu1 %v663_v39, %s3413_s8  ;;  %v1175_v39 = vrot.slane %v1173_v60, 1  ;;  %v1577_v60 = vshll.u32 %v3875_v48, 16 }
  0x66   : > { %718 = vrot.lane.b32.xlu0 %v567_v8, %s3413_s8  ;;  %v1335_v8 = vrot.slane %v2948_v57, 1  ;;  %v1080_v33 = vsel %vm519_vm1, %v1075_v16, %v1079_v20  ;;  %v3306_v16 = vld [vmem:[%s4907_s1 + $0x8] sm:$0x3f]   ;;  %v1589_v20 = vshll.u32 %v3888_v62, 16 }
  0x69   : > { %861 = vrot.lane.b32.xlu1 %v825_v25, %s3412_s7  ;;  %v2798_v25 = vld [vmem:[%s3501_s5 + $0x30] sm:$0xf] }
  0x6a   : > { %845 = vrot.lane.b32.xlu0 %v801_v27, %s3412_s7  ;;  %v2816_v27 = vld [vmem:[%s3501_s5 + $0x9c] sm:$0xf]  ;;  %v2956_v17 = vcombine.low %v2798_v25, %v3848_v29 }
  0x6b   : > { %v2965_v42 = vcombine.low %v2816_v27, %v3852_v32 }
  0x6c   : > { %v1572_v47 = vshll.u32 %v2956_v17, 16  ;;  %v1570_v4 = vshrl.u32 %v2956_v17, 16 }
  0x6d   : > { %863 = vrot.lane.b32.xlu1 %v828_v5, %s3412_s7  ;;  %v1338_v5 = vrot.slane %v2949_v63, 1  ;;  %v1680_v51 = vshll.u32 %v2965_v42, 16  ;;  %v1678_v61 = vshrl.u32 %v2965_v42, 16 }
  0x6e   : > { %847 = vrot.lane.b32.xlu0 %v804_v13, %s3412_s7  ;;  %v2957_v13 = vcombine.low %v2800_v12, %v3858_v36  ;;  %v1574_v56 = vrot.slane %v1572_v47, 1  ;;  %v1687_v12 = vrot.slane %v1685_v6, 1  ;;  %v223_v47 = vld [vmem:[%s3501_s5 + $0x9c] sm:$0xf] }
  0x6f   : > { %v1340_v49 = vsel %vm792_vm0, %v1338_v5, %v1339_v35  ;;  %v1682_v3 = vrot.slane %v1680_v51, 1  ;;  %v1591_v5 = vrot.slane %v1589_v20, 1  ;;  %v3936_v51 = vld [vmem:[%s3501_s5 + $0x40] sm:$0xf] }
  0x70   : > { %v1584_v52 = vshll.u32 %v2957_v13, 16  ;;  %v1582_v57 = vshrl.u32 %v2957_v13, 16  ;;  %v3965_v20 = vld [vmem:[%s3501_s5 + $0xa4] ss:$0 sps:$4 sm:$0x11]  }
  0x71   : > { %973 = vrot.lane.b32.xlu1 %v2916_v24, %s3411_s6  ;;  %v1312_v24 = vrot.slane %v3810_v19, 1 }
  0x72   : > { %957 = vrot.lane.b32.xlu0 %v2908_v28, %s3411_s6  ;;  %v1176_v28 = vsel %vm519_vm1, %v1171_v14, %v1175_v39  ;;  %v1586_v7 = vrot.slane %v1584_v52, 1  ;;  %v3895_v14 = vld [vmem:[%s3501_s5 + $0x94] sm:$0xf]  ;;  %v2996_v39 = vcombine.low %v2852_v1, %v3839_v22  ;;  %v2853_v52 = vld [vmem:[%s3501_s5 + $0x9c] sm:$0xe] }
  0x73   : > { %v1313_v19 = vsel %vm792_vm0, %v1311_v21, %v1312_v24  ;;  %v1575_v21 = vor.u32 %v1574_v56, %v1570_v4  ;;  %v1579_v24 = vrot.slane %v1577_v60, 1 }
  0x74   : > { %v1847_v35 = vrot.slane %v2996_v39, 1 }
  0x75   : > { %975 = vrot.lane.b32.xlu1 %v2917_v37, %s3411_s6  ;;  %v2964_v37 = vcombine.low %v2814_v0, %v3839_v22  ;;  %v3909_v0 = vcombine.low %v221_v9, %v3895_v14  ;;  %v3419_v22 = vmov 65535   ;;  %v2997_v9 = vcombine.low %v2853_v52, %v3852_v32 }
  0x76   : > { %959 = vrot.lane.b32.xlu0 %v2909_v41, %s3411_s6  ;;  %v1337_v41 = vsel %vm792_vm0, %v1335_v8, %v1336_v59  ;;  %v1675_v59 = vrot.slane %v1673_v58, 1  ;;  %v2211_v63 = vsel %vm2209_vm2, 4294967295, %v3419_v22  ;;  %v1824_v58 = vrot.slane %v3875_v48, 1 }
  0x77   : > { %v1668_v45 = vshll.u32 %v2964_v37, 16  ;;  %v1666_v55 = vshrl.u32 %v2964_v37, 16  ;;  %4921 = vst [vmem:[#allocation7_spill] sm:$0xff] %v3909_v0  ;;  %v665_v4 = vshrl.u32 %v3909_v0, 16  ;;  %v1849_v39 = vsel %vm792_vm0, %v1847_v35, %v1848_v44  ;;  %v257_v44 = vld [vmem:[%s3501_s5 + $0x90] sm:$0xe] }
  0x79   : > { %1245 = vrot.lane.b32.xlu1 %v1164_v10, %s3414_s9  ;;  %v1670_v34 = vrot.slane %v1668_v45, 1  ;;  %v2844_v10 = vld [vmem:[%s3501_s5 + $0x30] sm:$0xe] }
  0x7a   : > { %1229 = vrot.lane.b32.xlu0 %v1068_v15, %s3414_s9  ;;  %v3900_v15 = vld [vmem:[%s3501_s5 + $0x34] sm:$0xf]  ;;  %v2988_v27 = vcombine.low %v2844_v10, %v3848_v29  ;;  %v667_v29 = vshll.u32 %v3909_v0, 16 }
  0x7b   : > { %v1671_v8 = vor.u32 %v1670_v34, %v1666_v55  ;;  %v3912_v25 = vcombine.low %v205_v40, %v3900_v15 }
  0x7c   : > { %v1823_v34 = vrot.slane %v2988_v27, 1  ;;  %v669_v56 = vrot.slane %v667_v29, 1  ;;  %v1851_v27 = vrot.slane %v3880_v54, 1 }
  0x7d   : > { %1247 = vrot.lane.b32.xlu1 %v1176_v28, %s3414_s9  ;;  %4922 = vst [vmem:[#allocation8_spill] sm:$0xff] %v3912_v25  ;;  %v2212_v28 = vsel %vm2210_vm3, %v2211_v63, 0  ;;  %v571_v45 = vshll.u32 %v3912_v25, 16 }
  0x7e   : > { %1231 = vrot.lane.b32.xlu0 %v1080_v33, %s3414_s9  ;;  %v2214_v2 = vand.u32 %v3306_v16, %v2212_v28  ;;  %v1683_v33 = vor.u32 %v1682_v3, %v1678_v61  ;;  %v569_v3 = vshrl.u32 %v3912_v25, 16  ;;  %v670_v40 = vor.u32 %v669_v56, %v665_v4  ;;  %v258_v56 = vld [vmem:[%s3501_s5 + $0x9c] sm:$0xe] }
  0x7f   : > { %v573_v6 = vrot.slane %v571_v45, 1  ;;  %v1825_v22 = vsel %vm792_vm0, %v1823_v34, %v1824_v58  ;;  %v1850_v28 = vrot.slane %v2997_v9, 1  ;;  %v249_v45 = vld [vmem:[%s3501_s5 + $0x30] sm:$0xe] }
  0x80   : > { %3112 = vmatprep.subr.bf16.mxu0 %v2214_v2  ;;  %3147 = vmatprep.subr.bf16.mxu1 %v2214_v2  ;;  %v1688_v55 = vsel %vm519_vm1, %v1683_v33, %v1687_v12  ;;  %v1827_v33 = vrot.slane %v3888_v62, 1  ;;  %v2894_v4 = vcombine.low %v249_v45, %v3900_v15 }
  0x81   : > { %1373 = vrot.lane.b32.xlu1 %v1337_v41, %s3415_s10  ;;  %v1676_v41 = vsel %vm519_vm1, %v1671_v8, %v1675_v59  ;;  %3113 = vmatpush3.bf16.msra.mxu0 %v2214_v2  ;;  %v574_v63 = vor.u32 %v573_v6, %v569_v3  ;;  %v250_v3 = vld [vmem:[%s3501_s5 + $0x3c] sm:$0xe] }
  0x82   : > { %1357 = vrot.lane.b32.xlu0 %v1313_v19, %s3415_s10  ;;  %v1580_v19 = vsel %vm519_vm1, %v1575_v21, %v1579_v24  ;;  %3149 = vmatpush3.bf16.msra.mxu1 %v2214_v2  ;;  %v3972_v21 = vld [vmem:[%s3501_s5 + $0x44] ss:$0 sps:$4 sm:$0x11]   ;;  %v2754_v6 = vld [vmem:[%s3501_s5 + $0x9c] sm:$0xf] }
  0x83   : > { %v588_v54 = vshll.u32 %v3972_v21, 16 }
  0x85   : > { %1375 = vrot.lane.b32.xlu1 %v1340_v49, %s3415_s10  ;;  %v207_v49 = vld [vmem:[%s3501_s5 + $0x3c] sm:$0xf]  ;;  %v590_v58 = vrot.slane %v588_v54, 1 }
  0x86   : > { %1359 = vrot.lane.b32.xlu0 %v1316_v11, %s3415_s10  ;;  %v2845_v11 = vld [vmem:[%s3501_s5 + $0x3c] sm:$0xe] }
  0x87   : > { %v2989_v10 = vcombine.low %v2845_v11, %v3858_v36  ;;  %v2902_v11 = vcombine.low %v257_v44, %v3895_v14  ;;  %v4047_v44 = vld [vmem:[%s3501_s5 + $0xa4] ss:$0 sps:$4 sm:$0x11]  }
  0x89   : > { %1485 = vrot.lane.b32.xlu1 %v2964_v37, %s3416_s11  ;;  %v1587_v37 = vor.u32 %v1586_v7, %v1582_v57  ;;  %v3955_v7 = vcombine.low %v207_v49, %v3936_v51  ;;  %v1826_v2 = vrot.slane %v2989_v10, 1  ;;  %v829_v9 = vrot.slane %v2902_v11, 1 }
  0x8a   : > { %1469 = vrot.lane.b32.xlu0 %v2956_v17, %s3416_s11  ;;  %v3917_v17 = vld [vmem:[%s3501_s5 + $0x98] ss:$0 sps:$4 sm:$0x11]  }
  0x8b   : > { %v1592_v46 = vsel %vm519_vm1, %v1587_v37, %v1591_v5  ;;  %v672_v60 = vshll.u32 %v3917_v17, 16  ;;  %4924 = vst [vmem:[#allocation10_spill] sm:$0xff] %v3955_v7  ;;  %v583_v36 = vshll.u32 %v3955_v7, 16  ;;  %v581_v29 = vshrl.u32 %v3955_v7, 16 }
  0x8c   : > { %v830_v15 = vrot.slane %v3917_v17, 1 }
  0x8d   : > { %1487 = vrot.lane.b32.xlu1 %v2965_v42, %s3416_s11  ;;  %v3923_v42 = vld [vmem:[%s3501_s5 + $0x38] ss:$0 sps:$4 sm:$0x11]   ;;  %v674_v16 = vrot.slane %v672_v60, 1 }
  0x8e   : > { %1471 = vrot.lane.b32.xlu0 %v2957_v13, %s3416_s11  ;;  %v3932_v13 = vld [vmem:[%s3501_s5 + $0xa0] sm:$0xf]  ;;  %v576_v57 = vshll.u32 %v3923_v42, 16 }
  0x8f   : > { %v3950_v61 = vcombine.low %v223_v47, %v3932_v13  ;;  %v675_v12 = vsel %vm519_vm1, %v670_v40, %v674_v16  ;;  %v1852_v47 = vsel %vm792_vm0, %v1850_v28, %v1851_v27  ;;  %v2903_v10 = vcombine.low %v258_v56, %v3932_v13  ;;  %v2756_v13 = vld [vmem:[%s3501_s5 + $0xa8] sm:$0xf]  ;;  %v4027_v28 = vld [vmem:[%s3501_s5 + $0xac] sm:$0xf] }
  0x90   : > { %v578_v32 = vrot.slane %v576_v57, 1  ;;  %v4006_v57 = vld [vmem:[%s3501_s5 + $0xa0] sm:$0xf]  ;;  %v805_v16 = vrot.slane %v2894_v4, 1  ;;  %v831_v27 = vsel %vm792_vm0, %v829_v9, %v830_v15  ;;  %v2919_v54 = vcombine.low %v2756_v13, %v4027_v28 }
  0x91   : > { %v3926_v43 = vpop.permute.xlu1 %969  ;;  %1757 = vrot.lane.b32.xlu1 %v1676_v41, %s3417_s14  ;;  %4923 = vst [vmem:[#allocation9_spill] sm:$0xff] %v3950_v61  ;;  %v679_v8 = vshll.u32 %v3950_v61, 16  ;;  %v677_v37 = vshrl.u32 %v3950_v61, 16  ;;  %v684_v41 = vshll.u32 %v3965_v20, 16  ;;  %v2918_v17 = vcombine.low %v2754_v6, %v4006_v57 }
  0x92   : > { %v3941_v1 = vpop.permute.xlu0 %953  ;;  %1741 = vrot.lane.b32.xlu0 %v1580_v19, %s3417_s14  ;;  %v579_v35 = vsel %vm519_vm1, %v574_v63, %v578_v32  ;;  %v585_v19 = vrot.slane %v583_v36, 1  ;;  %v2738_v63 = vld [vmem:[%s3501_s5 + $0x3c] sm:$0xf]  ;;  %v4019_v32 = vld [vmem:[%s3501_s5 + $0x40] sm:$0xf] }
  0x93   : > { %v681_v5 = vrot.slane %v679_v8, 1  ;;  %v686_v52 = vrot.slane %v684_v41, 1  ;;  %v806_v8 = vrot.slane %v3923_v42, 1  ;;  %v832_v42 = vrot.slane %v2903_v10, 1 }
  0x94   : > { %v586_v34 = vor.u32 %v585_v19, %v581_v29  ;;  %v1180_v19 = vshll.u32 %v2918_v17, 16  ;;  %v4069_v10 = vld [vmem:[%s3501_s5 + $0x50] ss:$0 sps:$4 sm:$0x11]  }
  0x95   : > { %v3957_v48 = vpop.permute.xlu1 %857  ;;  %1759 = vrot.lane.b32.xlu1 %v1688_v55, %s3417_s14  ;;  %v682_v49 = vor.u32 %v681_v5, %v677_v37  ;;  %v807_v5 = vsel %vm792_vm0, %v805_v16, %v806_v8  ;;  %v2790_v16 = vld [vmem:[%s3501_s5 + $0x9c] sm:$0xe] }
  0x96   : > { %1743 = vrot.lane.b32.xlu0 %v1592_v46, %s3417_s14  ;;  %v1828_v46 = vsel %vm792_vm0, %v1826_v2, %v1827_v33  ;;  %v591_v40 = vsel %vm519_vm1, %v586_v34, %v590_v58  ;;  %v2910_v2 = vcombine.low %v2738_v63, %v4019_v32  ;;  %v2740_v33 = vld [vmem:[%s3501_s5 + $0x48] sm:$0xf]  ;;  %v1178_v34 = vshrl.u32 %v2918_v17, 16  ;;  %v2782_v63 = vld [vmem:[%s3501_s5 + $0x3c] sm:$0xe] }
  0x97   : > { %v3968_v59 = vpop.permute.xlu0 %841  ;;  %v687_v14 = vsel %vm519_vm1, %v682_v49, %v686_v52  ;;  %v4055_v52 = vld [vmem:[%s3501_s5 + $0x44] ss:$0 sps:$4 sm:$0x11]   ;;  %v1182_v58 = vrot.slane %v1180_v19, 1  ;;  %v2950_v19 = vcombine.low %v2790_v16, %v4006_v57  ;;  %v2783_v57 = vld [vmem:[%s3501_s5 + $0x48] sm:$0xe] }
  0x98   : > { %v1082_v4 = vshrl.u32 %v2910_v2, 16  ;;  %v1089_v15 = vshll.u32 %v4055_v52, 16  ;;  %v1342_v16 = vrot.slane %v4047_v44, 1 }
  0x99   : > { %1885 = vrot.lane.b32.xlu1 %v1849_v39, %s3418_s20  ;;  %v1183_v8 = vor.u32 %v1182_v58, %v1178_v34 }
  0x9a   : > { %v3976_v24 = vpop.permute.xlu1 %859  ;;  %1869 = vrot.lane.b32.xlu0 %v1825_v22, %s3418_s20  ;;  %v2895_v22 = vcombine.low %v250_v3, %v3936_v51  ;;  %v833_v51 = vrot.slane %v3965_v20, 1  ;;  %v1185_v3 = vshll.u32 %v4047_v44, 16 }
  0x9c   : > { %v3988_v62 = vpop.permute.xlu0 %843  ;;  %v808_v41 = vrot.slane %v2895_v22, 1  ;;  %v834_v45 = vsel %vm792_vm0, %v832_v42, %v833_v51  ;;  %v1190_v22 = vshrl.u32 %v2919_v54, 16  ;;  %v1187_v13 = vrot.slane %v1185_v3, 1 }
  0x9d   : > { %736 = vrot.lane.b32.xlu1 %v675_v12, %s3413_s8  ;;  %v4035_v12 = vld [vmem:[%s3501_s5 + $0x4c] sm:$0xf] }
  0x9e   : > { %720 = vrot.lane.b32.xlu0 %v579_v35, %s3413_s8  ;;  %v809_v35 = vrot.slane %v3972_v21, 1  ;;  %v2911_v20 = vcombine.low %v2740_v33, %v4035_v12  ;;  %v1188_v34 = vsel %vm519_vm1, %v1183_v8, %v1187_v13  ;;  %v2802_v8 = vld [vmem:[%s3501_s5 + $0x48] sm:$0xf] }
  0x9f   : > { %v3995_v55 = vpop.permute.xlu1 %714 }
  0xa0   : > { %v4000_v60 = vpop.permute.xlu0 %712  ;;  %v810_v21 = vsel %vm792_vm0, %v808_v41, %v809_v35  ;;  %v1096_v56 = vshll.u32 %v2911_v20, 16  ;;  %v1094_v41 = vshrl.u32 %v2911_v20, 16 }
  0xa1   : > { %1887 = vrot.lane.b32.xlu1 %v1852_v47, %s3418_s20  ;;  %v1084_v47 = vshll.u32 %v2910_v2, 16 }
  0xa2   : > { %1871 = vrot.lane.b32.xlu0 %v1828_v46, %s3418_s20  ;;  %v1192_v46 = vshll.u32 %v2919_v54, 16  ;;  %v1098_v35 = vrot.slane %v1096_v56, 1 }
  0xa3   : > { %v4012_v39 = vpop.permute.xlu1 %730  ;;  %v1086_v6 = vrot.slane %v1084_v47, 1  ;;  %v2818_v47 = vld [vmem:[%s3501_s5 + $0xa8] sm:$0xf] }
  0xa4   : > { %v4021_v36 = vpop.permute.xlu0 %728  ;;  %v1194_v42 = vrot.slane %v1192_v46, 1  ;;  %v2791_v46 = vld [vmem:[%s3501_s5 + $0xa8] sm:$0xe] }
  0xa5   : > { %738 = vrot.lane.b32.xlu1 %v687_v14, %s3413_s8  ;;  %v4063_v14 = vld [vmem:[%s3501_s5 + $0xb0] ss:$0 sps:$4 sm:$0x11]  }
  0xa6   : > { %722 = vrot.lane.b32.xlu0 %v591_v40, %s3413_s8  ;;  %v1197_v51 = vshll.u32 %v4063_v14, 16  ;;  %v1195_v58 = vor.u32 %v1194_v42, %v1190_v22  ;;  %v4105_v22 = vld [vmem:[%s3501_s5 + $0x4c] sm:$0xf]  ;;  %v2820_v42 = vld [vmem:[%s3501_s5 + $0xb4] sm:$0xf] }
  0xa7   : > { %v4037_v37 = vpop.permute.xlu1 %971 }
  0xa8   : > { %v4041_v29 = vpop.permute.xlu0 %955 }
  0xa9   : > { %865 = vrot.lane.b32.xlu1 %v831_v27, %s3412_s7  ;;  %v1087_v27 = vor.u32 %v1086_v6, %v1082_v4  ;;  %v1199_v4 = vrot.slane %v1197_v51, 1  ;;  %v1099_v6 = vor.u32 %v1098_v35, %v1094_v41  ;;  %v4112_v51 = vld [vmem:[%s3501_s5 + $0xb8] sm:$0xf]  ;;  %v2804_v41 = vld [vmem:[%s3501_s5 + $0x54] sm:$0xf] }
  0xaa   : > { %849 = vrot.lane.b32.xlu0 %v807_v5, %s3412_s7  ;;  %v1091_v5 = vrot.slane %v1089_v15, 1 }
  0xab   : > { %v4051_v49 = vpop.permute.xlu1 %1241  ;;  %v1200_v44 = vsel %vm519_vm1, %v1195_v58, %v1199_v4  ;;  %v1345_v4 = vrot.slane %v4063_v14, 1 }
  0xac   : > { %v4057_v11 = vpop.permute.xlu0 %1225  ;;  %v1092_v3 = vsel %vm519_vm1, %v1087_v27, %v1091_v5  ;;  %v1318_v27 = vrot.slane %v4055_v52, 1  ;;  %v2943_v5 = vcombine.low %v2783_v57, %v4035_v12  ;;  %v4126_v52 = vld [vmem:[%s3501_s5 + $0x58] sm:$0xf] }
  0xad   : > { %867 = vrot.lane.b32.xlu1 %v834_v45, %s3412_s7 }
  0xae   : > { %851 = vrot.lane.b32.xlu0 %v810_v21, %s3412_s7  ;;  %v2942_v21 = vcombine.low %v2782_v63, %v4019_v32  ;;  %v2951_v63 = vcombine.low %v2791_v46, %v4027_v28  ;;  %v1320_v57 = vrot.slane %v2943_v5, 1  ;;  %v1899_v5 = vsel %vm1897_vm4, %v3538_v23, %v4000_v60 }
  0xaf   : > { %v4065_v9 = vpop.permute.xlu1 %1243 }
  0xb0   : > { %v4071_v40 = vpop.permute.xlu0 %1227  ;;  %v1317_v13 = vrot.slane %v2942_v21, 1  ;;  %v4134_v21 = vcombine.low %v2820_v42, %v4112_v51  ;;  %v1344_v58 = vrot.slane %v2951_v63, 1  ;;  %v4161_v42 = vld [vmem:[%s3501_s5 + $0xbc] ss:$0 sps:$4 sm:$0x11]  }
  0xb1   : > { %977 = vrot.lane.b32.xlu1 %v2918_v17, %s3411_s6  ;;  %v1101_v17 = vshll.u32 %v4069_v10, 16 }
  0xb2   : > { %961 = vrot.lane.b32.xlu0 %v2910_v2, %s3411_s6  ;;  %v4086_v2 = vld [vmem:[%s3501_s5 + $0xac] sm:$0xf] }
  0xb3   : > { %v4078_v33 = vpop.permute.xlu1 %1369  ;;  %v1103_v32 = vrot.slane %v1101_v17, 1 }
  0xb4   : > { %v4082_v45 = vpop.permute.xlu0 %1353 }
  0xb5   : > { %979 = vrot.lane.b32.xlu1 %v2919_v54, %s3411_s6  ;;  %v4098_v54 = vcombine.low %v2818_v47, %v4086_v2  ;;  %v1104_v17 = vsel %vm519_vm1, %v1099_v6, %v1103_v32  ;;  %v4129_v47 = vld [vmem:[%s3501_s5 + $0xb0] ss:$0 sps:$4 sm:$0x11]   ;;  %v4143_v6 = vcombine.low %v2804_v41, %v4126_v52 }
  0xb6   : > { %963 = vrot.lane.b32.xlu0 %v2911_v20, %s3411_s6  ;;  %v1341_v20 = vrot.slane %v2950_v19, 1  ;;  %v4123_v19 = vcombine.low %v2802_v8, %v4105_v22  ;;  %v1697_v63 = vshll.u32 %v4129_v47, 16 }
  0xb7   : > { %v4094_v56 = vpop.permute.xlu1 %1371  ;;  %v1692_v28 = vshll.u32 %v4098_v54, 16 }
  0xb8   : > { %v4100_v15 = vpop.permute.xlu0 %1355  ;;  %v1343_v46 = vsel %vm792_vm0, %v1341_v20, %v1342_v16  ;;  %v1596_v8 = vshll.u32 %v4123_v19, 16  ;;  %v1690_v20 = vshrl.u32 %v4098_v54, 16  ;;  %v1699_v61 = vrot.slane %v1697_v63, 1 }
  0xb9   : > { %1249 = vrot.lane.b32.xlu1 %v1188_v34, %s3414_s9  ;;  %v1319_v34 = vsel %vm792_vm0, %v1317_v13, %v1318_v27  ;;  %v1694_v16 = vrot.slane %v1692_v28, 1  ;;  %v4154_v13 = vld [vmem:[%s3501_s5 + $0x50] ss:$0 sps:$4 sm:$0x11]   ;;  %v1915_v27 = vsel %vm1897_vm4, %v3533_v18, %v4021_v36  ;;  %v1608_v18 = vshll.u32 %v4143_v6, 16 }
  0xba   : > { %1233 = vrot.lane.b32.xlu0 %v1092_v3, %s3414_s9  ;;  %v1321_v3 = vrot.slane %v4069_v10, 1  ;;  %v1704_v10 = vshll.u32 %v4134_v21, 16  ;;  %v4172_v36 = vld [vmem:[%s3501_s5 + $0x5c] ss:$0 sps:$4 sm:$0x11]   ;;  %v1594_v25 = vshrl.u32 %v4123_v19, 16  ;;  %v1948_v23 = vsel %vm1930_vm5, %v1915_v27, %v3957_v48 }
  0xbb   : > { %v4118_v35 = vpop.permute.xlu1 %1481  ;;  %v1695_v7 = vor.u32 %v1694_v16, %v1690_v20  ;;  %v1598_v0 = vrot.slane %v1596_v8, 1  ;;  %v1606_v8 = vshrl.u32 %v4143_v6, 16  ;;  %v1610_v16 = vrot.slane %v1608_v18, 1 }
  0xbc   : > { %v4131_v12 = vpop.permute.xlu0 %1465  ;;  %v1322_v41 = vsel %vm792_vm0, %v1320_v57, %v1321_v3  ;;  %v1932_v57 = vsel %vm1930_vm5, %v1899_v5, %v3968_v59  ;;  %v1709_v3 = vshll.u32 %v4161_v42, 16  ;;  %v1613_v63 = vshll.u32 %v4172_v36, 16  ;;  %v4191_v59 = vld [vmem:[%s3501_s5 + $0xac] sm:$0xf] }
  0xbd   : > { %1251 = vrot.lane.b32.xlu1 %v1200_v44, %s3414_s9  ;;  %v1346_v44 = vsel %vm792_vm0, %v1344_v58, %v1345_v4  ;;  %v1702_v58 = vshrl.u32 %v4134_v21, 16  ;;  %v1706_v4 = vrot.slane %v1704_v10, 1  ;;  %v225_v10 = vld [vmem:[%s3501_s5 + $0xa8] sm:$0xf]  ;;  %v1981_v27 = vsel %vm1963_vm6, %v1948_v23, %v3926_v43 }
  0xbe   : > { %1235 = vrot.lane.b32.xlu0 %v1104_v17, %s3414_s9  ;;  %v2854_v17 = vld [vmem:[%s3501_s5 + $0xa8] sm:$0xe] }
  0xbf   : > { %v4145_v32 = vpop.permute.xlu1 %1483  ;;  %v2998_v48 = vcombine.low %v2854_v17, %v4086_v2  ;;  %v2014_v2 = vsel %vm1996_vm7, %v1981_v27, %v4051_v49  ;;  %v1611_v49 = vor.u32 %v1610_v16, %v1606_v8  ;;  %v4267_v16 = vld [vmem:[%s3501_s5 + $0xb8] sm:$0xf]  ;;  %v211_v27 = vld [vmem:[%s3501_s5 + $0x54] sm:$0xf] }
  0xc0   : > { %v4150_v14 = vpop.permute.xlu0 %1467 }
  0xc1   : > { %1377 = vrot.lane.b32.xlu1 %v1343_v46, %s3415_s10  ;;  %v2846_v46 = vld [vmem:[%s3501_s5 + $0x48] sm:$0xe] }
  0xc2   : > { %1361 = vrot.lane.b32.xlu0 %v1319_v34, %s3415_s10  ;;  %v1601_v34 = vshll.u32 %v4154_v13, 16  ;;  %v2990_v20 = vcombine.low %v2846_v46, %v4105_v22  ;;  %v1965_v22 = vsel %vm1963_vm6, %v1932_v57, %v3941_v1  ;;  %v1707_v46 = vor.u32 %v1706_v4, %v1702_v58 }
  0xc3   : > { %v1754_v28 = vpop.permute.xlu1 %1753  ;;  %v1998_v43 = vsel %vm1996_vm7, %v1965_v22, %v4057_v11  ;;  %v1615_v11 = vrot.slane %v1613_v63, 1  ;;  %v1830_v57 = vrot.slane %v4154_v13, 1 }
  0xc4   : > { %v1738_v60 = vpop.permute.xlu0 %1737  ;;  %v1603_v18 = vrot.slane %v1601_v34, 1  ;;  %v2031_v1 = vsel %vm2029_vm8, %v1998_v43, %v4082_v45  ;;  %v4230_v45 = vcombine.low %v209_v30, %v4206_v26  ;;  %v1854_v30 = vrot.slane %v4129_v47, 1  ;;  %v2855_v43 = vld [vmem:[%s3501_s5 + $0xb4] sm:$0xe] }
  0xc5   : > { %1379 = vrot.lane.b32.xlu1 %v1346_v44, %s3415_s10  ;;  %v1700_v44 = vsel %vm519_vm1, %v1695_v7, %v1699_v61  ;;  %v2047_v61 = vsel %vm2029_vm8, %v2014_v2, %v4078_v33  ;;  %v1917_v33 = vsel %vm1897_vm4, %v3545_v31, %v4012_v39  ;;  %v1853_v31 = vrot.slane %v2998_v48, 1  ;;  %v4238_v39 = vld [vmem:[%s3501_s5 + $0xb0] ss:$0 sps:$4 sm:$0x11]  }
  0xc6   : > { %1363 = vrot.lane.b32.xlu0 %v1322_v41, %s3415_s10  ;;  %v1599_v41 = vor.u32 %v1598_v0, %v1594_v25  ;;  %v1711_v0 = vrot.slane %v1709_v3, 1  ;;  %v4215_v25 = vcombine.low %v225_v10, %v4191_v59  ;;  %v2080_v7 = vsel %vm2062_vm9, %v2047_v61, %v4118_v35  ;;  %v2847_v61 = vld [vmem:[%s3501_s5 + $0x54] sm:$0xe] }
  0xc7   : > { %v4195_v5 = vpop.permute.xlu1 %1755  ;;  %v2113_v23 = vsel %vm2095_vm10, %v2080_v7, %v1754_v28  ;;  %v1901_v35 = vsel %vm1897_vm4, %v3551_v38, %v3995_v55  ;;  %v1829_v38 = vrot.slane %v2990_v20, 1  ;;  %v4247_v28 = vld [vmem:[%s3501_s5 + $0x50] ss:$0 sps:$4 sm:$0x11]   ;;  %v595_v48 = vshll.u32 %v4230_v45, 16 }
  0xc8   : > { %v4202_v17 = vpop.permute.xlu0 %1739  ;;  %v691_v55 = vshll.u32 %v4215_v25, 16  ;;  %v1712_v47 = vsel %vm519_vm1, %v1707_v46, %v1711_v0  ;;  %v1934_v8 = vsel %vm1930_vm5, %v1901_v35, %v3988_v62  ;;  %v227_v20 = vld [vmem:[%s3501_s5 + $0xb4] sm:$0xf]  ;;  %v689_v62 = vshrl.u32 %v4215_v25, 16 }
  0xc9   : > { %1489 = vrot.lane.b32.xlu1 %v4098_v54, %s3416_s11  ;;  %v2064_v54 = vsel %vm2062_vm9, %v2031_v1, %v4131_v12  ;;  %v1967_v13 = vsel %vm1963_vm6, %v1934_v8, %v4041_v29  ;;  %v696_v10 = vshll.u32 %v4238_v39, 16  ;;  %v4296_v0 = vcombine.low %v227_v20, %v4267_v16 }
  0xca   : > { %1473 = vrot.lane.b32.xlu0 %v4123_v19, %s3416_s11  ;;  %v2097_v19 = vsel %vm2095_vm10, %v2064_v54, %v1738_v60  ;;  %v1950_v60 = vsel %vm1930_vm5, %v1917_v33, %v3976_v24  ;;  %v2000_v2 = vsel %vm1996_vm7, %v1967_v13, %v4071_v40  ;;  %v693_v29 = vrot.slane %v691_v55, 1 }
  0xcb   : > { %v1882_v34 = vpop.permute.xlu1 %1881  ;;  %v1983_v3 = vsel %vm1963_vm6, %v1950_v60, %v4037_v37  ;;  %v593_v40 = vshrl.u32 %v4230_v45, 16  ;;  %v2999_v33 = vcombine.low %v2855_v43, %v4112_v51  ;;  %v703_v51 = vshll.u32 %v4296_v0, 16  ;;  %v260_v43 = vld [vmem:[%s3501_s5 + $0xb4] sm:$0xe] }
  0xcc   : > { %v1866_v58 = vpop.permute.xlu0 %1865  ;;  %v2146_v4 = vsel %vm2128_vm11, %v2113_v23, %v1882_v34  ;;  %v2016_v37 = vsel %vm1996_vm7, %v1983_v3, %v4065_v9  ;;  %v600_v9 = vshll.u32 %v4247_v28, 16  ;;  %v698_v23 = vrot.slane %v696_v10, 1  ;;  %v4317_v34 = vld [vmem:[%s3501_s5 + $0xbc] ss:$0 sps:$4 sm:$0x11]  }
  0xcd   : > { %1491 = vrot.lane.b32.xlu1 %v4134_v21, %s3416_s11  ;;  %v2130_v12 = vsel %vm2128_vm11, %v2097_v19, %v1866_v58  ;;  %3130 = vmatprep.mubr.msk.bf16.mxu1 %vm2176_vm12, %v2146_v4  ;;  %v1604_v21 = vsel %vm519_vm1, %v1599_v41, %v1603_v18  ;;  %v4279_v41 = vld [vmem:[%s3501_s5 + $0x58] sm:$0xf]  ;;  %v2049_v22 = vsel %vm2029_vm8, %v2016_v37, %v4094_v56  ;;  %v4324_v4 = vld [vmem:[%s3501_s5 + $0x5c] ss:$0 sps:$4 sm:$0x11]   ;;  %v708_v3 = vshll.u32 %v4317_v34, 16 }
  0xce   : > { %1475 = vrot.lane.b32.xlu0 %v4143_v6, %s3416_s11  ;;  %3114 = vmatprep.mubr.msk.bf16.mxu0 %vm2176_vm12, %v2130_v12  ;;  %v1616_v6 = vsel %vm519_vm1, %v1611_v49, %v1615_v11  ;;  %v2033_v18 = vsel %vm2029_vm8, %v2000_v2, %v4100_v15  ;;  %v2082_v46 = vsel %vm2062_vm9, %v2049_v22, %v4145_v32  ;;  %v597_v15 = vrot.slane %v595_v48, 1  ;;  %v251_v37 = vld [vmem:[%s3501_s5 + $0x48] sm:$0xe] }
  0xcf   : > { %v4261_v24 = vpop.permute.xlu1 %732  ;;  %v2066_v56 = vsel %vm2062_vm9, %v2033_v18, %v4150_v14  ;;  %v4303_v32 = vcombine.low %v211_v27, %v4279_v41  ;;  %v2991_v14 = vcombine.low %v2847_v61, %v4126_v52  ;;  %v1831_v52 = vsel %vm792_vm0, %v1829_v38, %v1830_v57 }
  0xd0   : > { %v4273_v63 = vpop.permute.xlu0 %716  ;;  %v2099_v7 = vsel %vm2095_vm10, %v2066_v56, %v4202_v17  ;;  %v694_v17 = vor.u32 %v693_v29, %v689_v62  ;;  %v598_v19 = vor.u32 %v597_v15, %v593_v40  ;;  %v602_v58 = vrot.slane %v600_v9, 1  ;;  %v252_v40 = vld [vmem:[%s3501_s5 + $0x54] sm:$0xe] }
  0xd1   : > { %1761 = vrot.lane.b32.xlu1 %v1700_v44, %s3417_s14  ;;  %v2115_v44 = vsel %vm2095_vm10, %v2082_v46, %v4195_v5  ;;  %v1855_v5 = vsel %vm792_vm0, %v1853_v31, %v1854_v30  ;;  %v607_v12 = vshll.u32 %v4303_v32, 16  ;;  %v1856_v31 = vrot.slane %v2999_v33, 1  ;;  %v2758_v33 = vld [vmem:[%s3501_s5 + $0xb4] sm:$0xf] }
  0xd2   : > { %1745 = vrot.lane.b32.xlu0 %v1604_v21, %s3417_s14  ;;  %v1857_v30 = vrot.slane %v4161_v42, 1  ;;  %v1832_v60 = vrot.slane %v2991_v14, 1  ;;  %v1833_v21 = vrot.slane %v4172_v36, 1  ;;  %v699_v38 = vsel %vm519_vm1, %v694_v17, %v698_v23  ;;  %v259_v36 = vld [vmem:[%s3501_s5 + $0xa8] sm:$0xe] }
  0xd3   : > { %v1884_v1 = vpop.permute.xlu1 %1883  ;;  %v705_v57 = vrot.slane %v703_v51, 1  ;;  %v605_v48 = vshrl.u32 %v4303_v32, 16  ;;  %v609_v20 = vrot.slane %v607_v12, 1  ;;  %v612_v42 = vshll.u32 %v4324_v4, 16  ;;  %v4369_v14 = vld [vmem:[%s3501_s5 + $0xb8] sm:$0xf] }
  0xd4   : > { %v2148_v49 = vsel %vm2128_vm11, %v2115_v44, %v1884_v1  ;;  %v1868_v11 = vpop.permute.xlu0 %1867  ;;  %v1858_v62 = vsel %vm792_vm0, %v1856_v31, %v1857_v30  ;;  %v710_v27 = vrot.slane %v708_v3, 1  ;;  %v2904_v2 = vcombine.low %v259_v36, %v4191_v59  ;;  %v2760_v12 = vld [vmem:[%s3501_s5 + $0xc0] sm:$0xf]  ;;  %v4389_v31 = vld [vmem:[%s3501_s5 + $0xc4] sm:$0xf] }
  0xd5   : > { %v2132_v54 = vsel %vm2128_vm11, %v2099_v7, %v1868_v11  ;;  %1763 = vrot.lane.b32.xlu1 %v1712_v47, %s3417_s14  ;;  %3131 = vmatmul.mubr.msk.bf16.vlgmr.msra.gmra.mrb[0].mxu1 %vm2176_vm12, %v2148_v49  ;;  %v701_v47 = vshrl.u32 %v4296_v0, 16  ;;  %v1834_v29 = vsel %vm792_vm0, %v1832_v60, %v1833_v21  ;;  %v610_v9 = vor.u32 %v609_v20, %v605_v48  ;;  %v2744_v60 = vld [vmem:[%s3501_s5 + $0x60] sm:$0xf]  ;;  %v4395_v21 = vld [vmem:[%s3501_s5 + $0x64] sm:$0xf] }
  0xd6   : > { %1747 = vrot.lane.b32.xlu0 %v1616_v6, %s3417_s14  ;;  %3115 = vmatmul.mubr.msk.bf16.vlgmr.msra.gmra.mrb[0].mxu0 %vm2176_vm12, %v2132_v54  ;;  %v603_v6 = vsel %vm519_vm1, %v598_v19, %v602_v58  ;;  %v614_v18 = vrot.slane %v612_v42, 1  ;;  %v2896_v46 = vcombine.low %v251_v37, %v4206_v26  ;;  %v835_v56 = vrot.slane %v2904_v2, 1 }
  0xd7   : > { %v4320_v35 = vpop.permute.xlu1 %734  ;;  %v706_v10 = vor.u32 %v705_v57, %v701_v47  ;;  %v836_v44 = vrot.slane %v4238_v39, 1  ;;  %v2905_v1 = vcombine.low %v260_v43, %v4267_v16  ;;  %v812_v49 = vrot.slane %v4247_v28, 1  ;;  %v4375_v39 = vld [vmem:[%s3501_s5 + $0x58] sm:$0xf] }
  0xd8   : > { %v4327_v55 = vpop.permute.xlu0 %718  ;;  %v615_v26 = vsel %vm519_vm1, %v610_v9, %v614_v18  ;;  %v811_v7 = vrot.slane %v2896_v46, 1  ;;  %v2897_v11 = vcombine.low %v252_v40, %v4279_v41  ;;  %v839_v41 = vrot.slane %v4317_v34, 1  ;;  %v4399_v34 = vld [vmem:[%s3501_s5 + $0xbc] ss:$0 sps:$4 sm:$0x11]  }
  0xd9   : > { %1889 = vrot.lane.b32.xlu1 %v1855_v5, %s3418_s20  ;;  %v711_v59 = vsel %vm519_vm1, %v706_v10, %v710_v27  ;;  %v2742_v5 = vld [vmem:[%s3501_s5 + $0x54] sm:$0xf]  ;;  %v837_v28 = vsel %vm792_vm0, %v835_v56, %v836_v44  ;;  %v838_v16 = vrot.slane %v2905_v1, 1  ;;  %v2920_v17 = vcombine.low %v2758_v33, %v4369_v14  ;;  %v4405_v57 = vld [vmem:[%s3501_s5 + $0x5c] ss:$0 sps:$4 sm:$0x11]  }
  0xda   : > { %1873 = vrot.lane.b32.xlu0 %v1831_v52, %s3418_s20  ;;  %v813_v51 = vsel %vm792_vm0, %v811_v7, %v812_v49  ;;  %v814_v52 = vrot.slane %v2897_v11, 1  ;;  %v815_v19 = vrot.slane %v4324_v4, 1  ;;  %v2912_v58 = vcombine.low %v2742_v5, %v4375_v39  ;;  %v4418_v27 = vld [vmem:[%s3501_s5 + $0xc8] ss:$0 sps:$4 sm:$0x11]  }
  0xdb   : > { %v4336_v8 = vpop.permute.xlu1 %861  ;;  %v2921_v4 = vcombine.low %v2760_v12, %v4389_v31  ;;  %v1204_v47 = vshll.u32 %v2920_v17, 16  ;;  %v2913_v48 = vcombine.low %v2744_v60, %v4395_v21  ;;  %v1202_v36 = vshrl.u32 %v2920_v17, 16  ;;  %v4423_v46 = vld [vmem:[%s3501_s5 + $0x68] ss:$0 sps:$4 sm:$0x11]  }
  0xdc   : > { %v4342_v13 = vpop.permute.xlu0 %845  ;;  %v1108_v20 = vshll.u32 %v2912_v58, 16  ;;  %v1209_v37 = vshll.u32 %v4399_v34, 16  ;;  %v1113_v10 = vshll.u32 %v4405_v57, 16  ;;  %v1106_v9 = vshrl.u32 %v2912_v58, 16 }
  0xdd   : > { %740 = vrot.lane.b32.xlu1 %v699_v38, %s3413_s8  ;;  %v840_v38 = vsel %vm792_vm0, %v838_v16, %v839_v41  ;;  %v1216_v2 = vshll.u32 %v2921_v4, 16  ;;  %v1120_v43 = vshll.u32 %v2913_v48, 16  ;;  %v1214_v56 = vshrl.u32 %v2921_v4, 16  ;;  %v2792_v16 = vld [vmem:[%s3501_s5 + $0xb4] sm:$0xe] }
  0xde   : > { %724 = vrot.lane.b32.xlu0 %v603_v6, %s3413_s8  ;;  %v816_v6 = vsel %vm792_vm0, %v814_v52, %v815_v19  ;;  %v1110_v18 = vrot.slane %v1108_v20, 1  ;;  %v1115_v1 = vrot.slane %v1113_v10, 1  ;;  %v1221_v7 = vshll.u32 %v4418_v27, 16 }
  0xdf   : > { %v4349_v22 = vpop.permute.xlu1 %863  ;;  %v1118_v33 = vshrl.u32 %v2913_v48, 16  ;;  %v1122_v5 = vrot.slane %v1120_v43, 1  ;;  %v1348_v10 = vrot.slane %v4399_v34, 1  ;;  %v2824_v34 = vld [vmem:[%s3501_s5 + $0xcc] sm:$0xf] }
  0xe0   : > { %v4354_v61 = vpop.permute.xlu0 %847  ;;  %v1111_v11 = vor.u32 %v1110_v18, %v1106_v9  ;;  %v1223_v19 = vrot.slane %v1221_v7, 1  ;;  %v4460_v9 = vld [vmem:[%s3501_s5 + $0x64] sm:$0xf]  ;;  %v4474_v7 = vld [vmem:[%s3501_s5 + $0xd0] sm:$0xf] }
  0xe1   : > { %1891 = vrot.lane.b32.xlu1 %v1858_v62, %s3418_s20  ;;  %v1206_v62 = vrot.slane %v1204_v47, 1 }
  0xe2   : > { %1875 = vrot.lane.b32.xlu0 %v1834_v29, %s3418_s20  ;;  %v1116_v60 = vsel %vm519_vm1, %v1111_v11, %v1115_v1 }
  0xe3   : > { %v4362_v15 = vpop.permute.xlu1 %973  ;;  %v1207_v44 = vor.u32 %v1206_v62, %v1202_v36  ;;  %v2822_v36 = vld [vmem:[%s3501_s5 + $0xc0] sm:$0xf] }
  0xe4   : > { %v4371_v54 = vpop.permute.xlu0 %957 }
  0xe5   : > { %742 = vrot.lane.b32.xlu1 %v711_v59, %s3413_s8  ;;  %v1211_v59 = vrot.slane %v1209_v37, 1  ;;  %v4452_v37 = vld [vmem:[%s3501_s5 + $0xc4] sm:$0xf] }
  0xe6   : > { %726 = vrot.lane.b32.xlu0 %v615_v26, %s3413_s8  ;;  %v1218_v26 = vrot.slane %v1216_v2, 1  ;;  %v2806_v2 = vld [vmem:[%s3501_s5 + $0x60] sm:$0xf]  ;;  %s3091_s8 = sshll.u32 %s3469_s19, 11 }
  0xe7   : > { %v4382_v23 = vpop.permute.xlu1 %975 }
  0xe8   : > { %v4391_v30 = vpop.permute.xlu0 %959  ;;  %v1219_v52 = vor.u32 %v1218_v26, %v1214_v56  ;;  %v1324_v56 = vrot.slane %v4405_v57, 1  ;;  %v2968_v26 = vcombine.low %v2822_v36, %v4452_v37 }
  0xe9   : > { %869 = vrot.lane.b32.xlu1 %v837_v28, %s3412_s7  ;;  %v1125_v28 = vshll.u32 %v4423_v46, 16 }
  0xea   : > { %853 = vrot.lane.b32.xlu0 %v813_v51, %s3412_s7  ;;  %v1212_v51 = vsel %vm519_vm1, %v1207_v44, %v1211_v59 }
  0xeb   : > { %v4407_v3 = vpop.permute.xlu1 %1245  ;;  %v1127_v47 = vrot.slane %v1125_v28, 1 }
  0xec   : > { %v4411_v42 = vpop.permute.xlu0 %1229 }
  0xed   : > { %871 = vrot.lane.b32.xlu1 %v840_v38, %s3412_s7  ;;  %v1123_v38 = vor.u32 %v1122_v5, %v1118_v33 }
  0xee   : > { %855 = vrot.lane.b32.xlu0 %v816_v6, %s3412_s7 }
  0xef   : > { %v4420_v29 = vpop.permute.xlu1 %1247  ;;  %v1128_v43 = vsel %vm519_vm1, %v1123_v38, %v1127_v47  ;;  %v4502_v47 = vld [vmem:[%s3501_s5 + $0xd4] ss:$0 sps:$4 sm:$0x11]  }
  0xf0   : > { %v4425_v40 = vpop.permute.xlu0 %1231 }
  0xf1   : > { %981 = vrot.lane.b32.xlu1 %v2920_v17, %s3411_s6  ;;  %v2784_v17 = vld [vmem:[%s3501_s5 + $0x54] sm:$0xe] }
  0xf2   : > { %965 = vrot.lane.b32.xlu0 %v2912_v58, %s3411_s6  ;;  %v2952_v58 = vcombine.low %v2792_v16, %v4369_v14  ;;  %v2944_v6 = vcombine.low %v2784_v17, %v4375_v39  ;;  %v1224_v14 = vsel %vm519_vm1, %v1219_v52, %v1223_v19  ;;  %v1327_v16 = vrot.slane %v4423_v46, 1  ;;  %v4484_v17 = vld [vmem:[%s3501_s5 + $0xc8] ss:$0 sps:$4 sm:$0x11]   ;;  %v2808_v19 = vld [vmem:[%s3501_s5 + $0x6c] sm:$0xf] }
  0xf3   : > { %v4430_v49 = vpop.permute.xlu1 %1373  ;;  %v4489_v52 = vcombine.low %v2824_v34, %v4474_v7  ;;  %v1721_v36 = vshll.u32 %v4484_v17, 16 }
  0xf4   : > { %v4434_v41 = vpop.permute.xlu0 %1357  ;;  %v1347_v62 = vrot.slane %v2952_v58, 1  ;;  %v1323_v59 = vrot.slane %v2944_v6, 1  ;;  %v4493_v58 = vld [vmem:[%s3501_s5 + $0x70] sm:$0xf] }
  0xf5   : > { %983 = vrot.lane.b32.xlu1 %v2921_v4, %s3411_s6  ;;  %v2793_v4 = vld [vmem:[%s3501_s5 + $0xc0] sm:$0xe] }
  0xf6   : > { %967 = vrot.lane.b32.xlu0 %v2913_v48, %s3411_s6  ;;  %v2785_v48 = vld [vmem:[%s3501_s5 + $0x60] sm:$0xe]  ;;  %v2953_v39 = vcombine.low %v2793_v4, %v4389_v31  ;;  %v2960_v31 = vcombine.low %v2806_v2, %v4460_v9  ;;  %v1349_v57 = vsel %vm792_vm0, %v1347_v62, %v1348_v10  ;;  %v1325_v5 = vsel %vm792_vm0, %v1323_v59, %v1324_v56  ;;  %s2728_s6 = sshll.u32 %s188_s29, 7 }
  0xf7   : > { %v4441_v12 = vpop.permute.xlu1 %1375  ;;  %v2945_v44 = vcombine.low %v2785_v48, %v4395_v21  ;;  %v1351_v21 = vrot.slane %v4418_v27, 1  ;;  %v4497_v27 = vld [vmem:[%s3501_s5 + $0x68] ss:$0 sps:$4 sm:$0x11]   ;;  %v4506_v48 = vcombine.low %v2808_v19, %v4493_v58  ;;  %v1714_v62 = vshrl.u32 %v2968_v26, 16  ;;  %s4740_s7 = scalar_lea.vmem [#allocation2], %s2728_s6 }
  0xf8   : > { %v4446_v20 = vpop.permute.xlu0 %1359  ;;  %v1350_v11 = vrot.slane %v2953_v39, 1  ;;  %v1620_v38 = vshll.u32 %v2960_v31, 16  ;;  %v1728_v39 = vshll.u32 %v4489_v52, 16  ;;  %v1919_v2 = vsel %vm1897_vm4, %v3686_v50, %v4261_v24  ;;  %v4524_v50 = vld [vmem:[%s3501_s5 + $0x74] ss:$0 sps:$4 sm:$0x11]  }
  0xf9   : > { %1253 = vrot.lane.b32.xlu1 %v1212_v51, %s3414_s9  ;;  %v1326_v28 = vrot.slane %v2945_v44, 1  ;;  %v1625_v56 = vshll.u32 %v4497_v27, 16  ;;  %v1903_v44 = vsel %vm1897_vm4, %v3689_v53, %v4273_v63  ;;  %v1952_v34 = vsel %vm1930_vm5, %v1919_v2, %v4336_v8 }
  0xfa   : > { %1237 = vrot.lane.b32.xlu0 %v1116_v60, %s3414_s9  ;;  %v1716_v60 = vshll.u32 %v2968_v26, 16  ;;  %v1352_v46 = vsel %vm792_vm0, %v1350_v11, %v1351_v21  ;;  %v1622_v59 = vrot.slane %v1620_v38, 1  ;;  %v1733_v11 = vshll.u32 %v4502_v47, 16 }
  0xfb   : > { %v4462_v18 = vpop.permute.xlu1 %1485  ;;  %v1328_v4 = vsel %vm792_vm0, %v1326_v28, %v1327_v16  ;;  %v1936_v24 = vsel %vm1930_vm5, %v1903_v44, %v4342_v13  ;;  %v1985_v21 = vsel %vm1963_vm6, %v1952_v34, %v4362_v15  ;;  %v1723_v53 = vrot.slane %v1721_v36, 1 }
  0xfc   : > { %v4467_v1 = vpop.permute.xlu0 %1469  ;;  %v1718_v10 = vrot.slane %v1716_v60, 1  ;;  %v1632_v63 = vshll.u32 %v4506_v48, 16  ;;  %v1969_v8 = vsel %vm1963_vm6, %v1936_v24, %v4371_v54  ;;  %v2018_v28 = vsel %vm1996_vm7, %v1985_v21, %v4407_v3 }
  0xfd   : > { %1255 = vrot.lane.b32.xlu1 %v1224_v14, %s3414_s9  ;;  %v1730_v60 = vrot.slane %v1728_v39, 1  ;;  %v2002_v13 = vsel %vm1996_vm7, %v1969_v8, %v4411_v42  ;;  %v2051_v15 = vsel %vm2029_vm8, %v2018_v28, %v4430_v49  ;;  %v1637_v36 = vshll.u32 %v4524_v50, 16  ;;  %v2856_v42 = vld [vmem:[%s3501_s5 + $0xc0] sm:$0xe] }
  0xfe   : > { %1239 = vrot.lane.b32.xlu0 %v1128_v43, %s3414_s9  ;;  %v1618_v43 = vshrl.u32 %v2960_v31, 16  ;;  %v1719_v19 = vor.u32 %v1718_v10, %v1714_v62  ;;  %v2035_v54 = vsel %vm2029_vm8, %v2002_v13, %v4434_v41  ;;  %v2084_v3 = vsel %vm2062_vm9, %v2051_v15, %v4462_v18  ;;  %s2662_s9 = sshll.u32 %s4740_s7, 4  ;;  %s4851_s9 = int_to_ptr.vmem [resolvable:$true] %s2662_s9 }
  0xff   : > { %v4479_v33 = vpop.permute.xlu1 %1487  ;;  %v2068_v49 = vsel %vm2062_vm9, %v2035_v54, %v4467_v1  ;;  %v1630_v10 = vshrl.u32 %v4506_v48, 16  ;;  %v1634_v39 = vrot.slane %v1632_v63, 1  ;;  %v1860_v28 = vrot.slane %v4484_v17, 1  ;;  %s3347_s13 = scalar_lea.vmem %s4851_s9, 2048 }
 0x100   : > { %v4486_v51 = vpop.permute.xlu0 %1471  ;;  %v1623_v38 = vor.u32 %v1622_v59, %v1618_v43  ;;  %v2848_v59 = vld [vmem:[%s3501_s5 + $0x60] sm:$0xe]  ;;  %p3348_p11 = scmp.ne.s32.totalorder %s4851_s9, %s3347_s13 }
 0x101   : > { %1381 = vrot.lane.b32.xlu1 %v1349_v57, %s3415_s10  ;;  %v1726_v57 = vshrl.u32 %v4489_v52, 16  ;;  %v2992_v21 = vcombine.low %v2848_v59, %v4460_v9 }
 0x102   : > { %1365 = vrot.lane.b32.xlu0 %v1325_v5, %s3415_s10  ;;  %p3349_p12 = pnand %p3348_p11, %p3486_p5 }
 0x103   : > { %v1758_v6 = vpop.permute.xlu1 %1757  ;;  %v1731_v43 = vor.u32 %v1730_v60, %v1726_v57 }
 0x104   : > { %v1742_v14 = vpop.permute.xlu0 %1741  ;;  %p3350_p13 = pneg %p3349_p12 }
 0x105   : > { %1383 = vrot.lane.b32.xlu1 %v1352_v46, %s3415_s10  ;;  %v1627_v46 = vrot.slane %v1625_v56, 1  ;;  %v2101_v41 = vsel %vm2095_vm10, %v2068_v49, %v1742_v14  ;;  %v4925_v56 = vld [vmem:[#allocation5_spill] sm:$0xff]  ;;  %v4926_v14 = vld [vmem:[#allocation6_spill] sm:$0xff] }
 0x106   : > { %1367 = vrot.lane.b32.xlu0 %v1328_v4, %s3415_s10  ;;  %v1735_v4 = vrot.slane %v1733_v11, 1  ;;  %v1921_v44 = vsel %vm1897_vm4, %v4925_v56, %v4320_v35  ;;  %v1905_v34 = vsel %vm1897_vm4, %v4926_v14, %v4327_v55  ;;  %v1639_v11 = vrot.slane %v1637_v36, 1 }
 0x107   : > { %v4530_v5 = vpop.permute.xlu1 %1759  ;;  %v1954_v57 = vsel %vm1930_vm5, %v1921_v44, %v4349_v22  ;;  %v1628_v35 = vsel %vm519_vm1, %v1623_v38, %v1627_v46  ;;  %v1635_v55 = vor.u32 %v1634_v39, %v1630_v10  ;;  %v2857_v22 = vld [vmem:[%s3501_s5 + $0xcc] sm:$0xe]  ;;  %v1835_v38 = vrot.slane %v2992_v21, 1  ;;  %v4928_v21 = vld [vmem:[#allocation8_spill] sm:$0xff] }
 0x108   : > { %v4537_v16 = vpop.permute.xlu0 %1743  ;;  %v3001_v17 = vcombine.low %v2857_v22, %v4474_v7 }
 0x109   : > { %1493 = vrot.lane.b32.xlu1 %v2968_v26, %s3416_s11  ;;  %v2117_v26 = vsel %vm2095_vm10, %v2084_v3, %v1758_v6  ;;  %v3000_v6 = vcombine.low %v2856_v42, %v4452_v37  ;;  %v1987_v37 = vsel %vm1963_vm6, %v1954_v57, %v4382_v23 }
 0x10a   : > { %1477 = vrot.lane.b32.xlu0 %v2960_v31, %s3416_s11  ;;  %v1724_v31 = vsel %vm519_vm1, %v1719_v19, %v1723_v53  ;;  %v2849_v53 = vld [vmem:[%s3501_s5 + $0x6c] sm:$0xe]  ;;  %v2020_v63 = vsel %vm1996_vm7, %v1987_v37, %v4420_v29  ;;  %v4927_v37 = vld [vmem:[#allocation7_spill] sm:$0xff] }
 0x10b   : > { %v1886_v62 = vpop.permute.xlu1 %1885  ;;  %v2053_v9 = vsel %vm2029_vm8, %v2020_v63, %v4441_v12  ;;  %v1859_v19 = vrot.slane %v3000_v6, 1 }
 0x10c   : > { %v2150_v2 = vsel %vm2128_vm11, %v2117_v26, %v1886_v62  ;;  %v1870_v18 = vpop.permute.xlu0 %1869  ;;  %v2086_v60 = vsel %vm2062_vm9, %v2053_v9, %v4479_v33 }
 0x10d   : > { %v2134_v1 = vsel %vm2128_vm11, %v2101_v41, %v1870_v18  ;;  %1495 = vrot.lane.b32.xlu1 %v4489_v52, %s3416_s11  ;;  %3134 = vmatprep.mubr.msk.bf16.mxu1 %vm2176_vm12, %v2150_v2  ;;  %v1938_v52 = vsel %vm1930_vm5, %v1905_v34, %v4354_v61  ;;  %v1736_v61 = vsel %vm519_vm1, %v1731_v43, %v1735_v4  ;;  %v1839_v4 = vrot.slane %v4524_v50, 1 }
 0x10e   : > { %1479 = vrot.lane.b32.xlu0 %v4506_v48, %s3416_s11  ;;  %3118 = vmatprep.mubr.msk.bf16.mxu0 %vm2176_vm12, %v2134_v1  ;;  %v1971_v48 = vsel %vm1963_vm6, %v1938_v52, %v4391_v30  ;;  %v1836_v30 = vrot.slane %v4497_v27, 1  ;;  %v2119_v13 = vsel %vm2095_vm10, %v2086_v60, %v4530_v5  ;;  %v1640_v27 = vsel %vm519_vm1, %v1635_v55, %v1639_v11  ;;  %s4849_s11 = scalar_lea.hbm %s4910_s4, %s3091_s8 }
 0x10f   : > { %v4580_v24 = vpop.permute.xlu1 %736  ;;  %v2004_v23 = vsel %vm1996_vm7, %v1971_v48, %v4425_v40  ;;  %v2993_v40 = vcombine.low %v2849_v53, %v4493_v58  ;;  %v1862_v58 = vrot.slane %v3001_v17, 1  ;;  %v1863_v5 = vrot.slane %v4502_v47, 1 }
 0x110   : > { %v4589_v8 = vpop.permute.xlu0 %720  ;;  %v2037_v29 = vsel %vm2029_vm8, %v2004_v23, %v4446_v20  ;;  %v1923_v55 = vsel %vm1897_vm4, %v4927_v37, %v4580_v24 }
 0x111   : > { %1765 = vrot.lane.b32.xlu1 %v1724_v31, %s3417_s14  ;;  %v2070_v12 = vsel %vm2062_vm9, %v2037_v29, %v4486_v51  ;;  %v1861_v51 = vsel %vm792_vm0, %v1859_v19, %v1860_v28  ;;  %v1838_v3 = vrot.slane %v2993_v40, 1  ;;  %v1864_v42 = vsel %vm792_vm0, %v1862_v58, %v1863_v5 }
 0x112   : > { %1749 = vrot.lane.b32.xlu0 %v1628_v35, %s3417_s14  ;;  %v2103_v20 = vsel %vm2095_vm10, %v2070_v12, %v4537_v16  ;;  %v1837_v16 = vsel %vm792_vm0, %v1835_v38, %v1836_v30  ;;  %v1907_v22 = vsel %vm1897_vm4, %v4928_v21, %v4589_v8 }
 0x113   : > { %v1888_v15 = vpop.permute.xlu1 %1887  ;;  %v1840_v26 = vsel %vm792_vm0, %v1838_v3, %v1839_v4 }
 0x114   : > { %v2152_v33 = vsel %vm2128_vm11, %v2119_v13, %v1888_v15  ;;  %v1872_v46 = vpop.permute.xlu0 %1871  ;;  %v4929_v15 = vld [vmem:[#allocation9_spill] sm:$0xff] }
 0x115   : > { %v2136_v7 = vsel %vm2128_vm11, %v2103_v20, %v1872_v46  ;;  %1767 = vrot.lane.b32.xlu1 %v1736_v61, %s3417_s14  ;;  %3135 = vmatmul.mubr.msk.bf16.gmra.mrb[4].mxu1 %vm2176_vm12, %v2152_v33  ;;  %v4930_v20 = vld [vmem:[#allocation10_spill] sm:$0xff] }
 0x116   : > { %1751 = vrot.lane.b32.xlu0 %v1640_v27, %s3417_s14  ;;  %3119 = vmatmul.mubr.msk.bf16.gmra.mrb[4].mxu0 %vm2176_vm12, %v2136_v7  ;;  %s3420_s14 = smov [#allocation2]  }
 0x117   : > { %v739_v54 = vpop.permute.xlu1 %738 }
 0x118   : > { %v723_v36 = vpop.permute.xlu0 %722  ;;  %v1925_v27 = vsel %vm1897_vm4, %v4929_v15, %v739_v54 }
 0x119   : > { %1893 = vrot.lane.b32.xlu1 %v1861_v51, %s3418_s20  ;;  %v1909_v33 = vsel %vm1897_vm4, %v4930_v20, %v723_v36 }
 0x11a   : > { %1877 = vrot.lane.b32.xlu0 %v1837_v16, %s3418_s20 }
 0x11b   : > { %v866_v49 = vpop.permute.xlu1 %865 }
 0x11c   : > { %v850_v62 = vpop.permute.xlu0 %849  ;;  %v1956_v53 = vsel %vm1930_vm5, %v1923_v55, %v866_v49 }
 0x11d   : > { %1895 = vrot.lane.b32.xlu1 %v1864_v42, %s3418_s20  ;;  %v1940_v48 = vsel %vm1930_vm5, %v1907_v22, %v850_v62 }
 0x11e   : > { %1879 = vrot.lane.b32.xlu0 %v1840_v26, %s3418_s20  ;;  %s3351_s20 = sshll.u32 %s3420_s14, 4  ;;  %s3352_s20 = int_to_ptr.vmem [resolvable:$false] %s3351_s20 }
 0x11f   : > { %v868_v47 = vpop.permute.xlu1 %867  ;;  %s3353_s22 = scalar_lea.vmem %s3352_s20, 4096  ;;  %p3354_p0 = scmp.lt.s32.totalorder %s4851_s9, %s3352_s20 }
 0x120   : > { %v852_v10 = vpop.permute.xlu0 %851  ;;  %v1958_v46 = vsel %vm1930_vm5, %v1925_v27, %v868_v47  ;;  %p3355_p1 = scmp.lt.s32.totalorder %s3353_s22, %s3347_s13 }
 0x121   : > { %v1942_v7 = vsel %vm1930_vm5, %v1909_v33, %v852_v10 }
 0x122   : > { %p3356_p2 = por %p3355_p1, %p3354_p0 }
 0x123   : > { %v978_v39 = vpop.permute.xlu1 %977 }
 0x124   : > { %v962_v41 = vpop.permute.xlu0 %961  ;;  %v1989_v63 = vsel %vm1963_vm6, %v1956_v53, %v978_v39  ;;  %p3357_p3 = pnand %p3356_p2, %p3350_p13 }
 0x125   : > { %v1973_v28 = vsel %vm1963_vm6, %v1940_v48, %v962_v41 }
 0x127   : > { %v980_v50 = vpop.permute.xlu1 %979 }
 0x128   : > { %v964_v2 = vpop.permute.xlu0 %963  ;;  %v1991_v51 = vsel %vm1963_vm6, %v1958_v46, %v980_v50 }
 0x129   : > { %v1975_v5 = vsel %vm1963_vm6, %v1942_v7, %v964_v2 }
 0x12b   : > { %v1250_v18 = vpop.permute.xlu1 %1249 }
 0x12c   : > { %v1234_v31 = vpop.permute.xlu0 %1233  ;;  %v2022_v23 = vsel %vm1996_vm7, %v1989_v63, %v1250_v18 }
 0x12d   : > { %v2006_v19 = vsel %vm1996_vm7, %v1973_v28, %v1234_v31 }
 0x12f   : > { %v1252_v43 = vpop.permute.xlu1 %1251 }
 0x130   : > { %v1236_v59 = vpop.permute.xlu0 %1235  ;;  %v2024_v54 = vsel %vm1996_vm7, %v1991_v51, %v1252_v43 }
 0x131   : > { %v2008_v3 = vsel %vm1996_vm7, %v1975_v5, %v1236_v59 }
 0x133   : > { %v1378_v56 = vpop.permute.xlu1 %1377 }
 0x134   : > { %v1362_v44 = vpop.permute.xlu0 %1361  ;;  %v2055_v24 = vsel %vm2029_vm8, %v2022_v23, %v1378_v56 }
 0x135   : > { %v2039_v30 = vsel %vm2029_vm8, %v2006_v19, %v1362_v44 }
 0x137   : > { %v1380_v1 = vpop.permute.xlu1 %1379 }
 0x138   : > { %v1364_v6 = vpop.permute.xlu0 %1363  ;;  %v2057_v4 = vsel %vm2029_vm8, %v2024_v54, %v1380_v1 }
 0x139   : > { %v2041_v36 = vsel %vm2029_vm8, %v2008_v3, %v1364_v6 }
 0x13b   : > { %v1490_v14 = vpop.permute.xlu1 %1489 }
 0x13c   : > { %v1474_v34 = vpop.permute.xlu0 %1473  ;;  %v2088_v8 = vsel %vm2062_vm9, %v2055_v24, %v1490_v14 }
 0x13d   : > { %v2072_v29 = vsel %vm2062_vm9, %v2039_v30, %v1474_v34 }
 0x13f   : > { %v1492_v57 = vpop.permute.xlu1 %1491 }
 0x140   : > { %v1476_v35 = vpop.permute.xlu0 %1475  ;;  %v2090_v42 = vsel %vm2062_vm9, %v2057_v4, %v1492_v57 }
 0x141   : > { %v2074_v49 = vsel %vm2062_vm9, %v2041_v36, %v1476_v35 }
 0x143   : > { %v1762_v11 = vpop.permute.xlu1 %1761 }
 0x144   : > { %v1746_v52 = vpop.permute.xlu0 %1745  ;;  %v2121_v60 = vsel %vm2095_vm10, %v2088_v8, %v1762_v11 }
 0x145   : > { %v2105_v40 = vsel %vm2095_vm10, %v2072_v29, %v1746_v52 }
 0x147   : > { %v1764_v61 = vpop.permute.xlu1 %1763 }
 0x148   : > { %v1748_v9 = vpop.permute.xlu0 %1747  ;;  %v2123_v26 = vsel %vm2095_vm10, %v2090_v42, %v1764_v61 }
 0x149   : > { %v2107_v47 = vsel %vm2095_vm10, %v2074_v49, %v1748_v9 }
 0x14b   : > { %v1890_v17 = vpop.permute.xlu1 %1889 }
 0x14c   : > { %v2154_v12 = vsel %vm2128_vm11, %v2121_v60, %v1890_v17  ;;  %v1874_v13 = vpop.permute.xlu0 %1873 }
 0x14d   : > { %v2138_v38 = vsel %vm2128_vm11, %v2105_v40, %v1874_v13  ;;  %3138 = vmatprep.mubr.msk.bf16.mxu1 %vm2176_vm12, %v2154_v12 }
 0x14e   : > { %3122 = vmatprep.mubr.msk.bf16.mxu0 %vm2176_vm12, %v2138_v38 }
 0x14f   : > { %v741_v58 = vpop.permute.xlu1 %740 }
 0x150   : > { %v725_v16 = vpop.permute.xlu0 %724  ;;  %v1927_v28 = vsel %vm1897_vm4, %v4215_v25, %v741_v58 }
 0x151   : > { %v1911_v23 = vsel %vm1897_vm4, %v4230_v45, %v725_v16 }
 0x153   : > { %v1892_v62 = vpop.permute.xlu1 %1891 }
 0x154   : > { %v2156_v10 = vsel %vm2128_vm11, %v2123_v26, %v1892_v62  ;;  %v1876_v39 = vpop.permute.xlu0 %1875 }
 0x155   : > { %v2140_v41 = vsel %vm2128_vm11, %v2107_v47, %v1876_v39  ;;  %3139 = vmatmul.mubr.msk.bf16.gmra.mrb[8].mxu1 %vm2176_vm12, %v2156_v10  ;;  %v4714_v39 = vld [vmem:[%s4908_s2] ss:$0 sm:$0xff] }
 0x156   : > { %3123 = vmatmul.mubr.msk.bf16.gmra.mrb[8].mxu0 %vm2176_vm12, %v2140_v41  ;;  %v4720_v41 = vld [vmem:[%s4909_s3] ss:$0 sm:$0xff] }
 0x157   : > { %v743_v50 = vpop.permute.xlu1 %742 }
 0x158   : > { %v727_v2 = vpop.permute.xlu0 %726  ;;  %v1929_v17 = vsel %vm1897_vm4, %v4296_v0, %v743_v50 }
 0x159   : > { %v1913_v45 = vsel %vm1897_vm4, %v4303_v32, %v727_v2 }
 0x15b   : > { %v870_v18 = vpop.permute.xlu1 %869 }
 0x15c   : > { %v854_v31 = vpop.permute.xlu0 %853  ;;  %v1960_v9 = vsel %vm1930_vm5, %v1927_v28, %v870_v18 }
 0x15d   : > { %v1944_v19 = vsel %vm1930_vm5, %v1911_v23, %v854_v31 }
 0x15f   : > { %v872_v43 = vpop.permute.xlu1 %871 }
 0x160   : > { %v856_v59 = vpop.permute.xlu0 %855  ;;  %v1962_v12 = vsel %vm1930_vm5, %v1929_v17, %v872_v43 }
 0x161   : > { %v1946_v27 = vsel %vm1930_vm5, %v1913_v45, %v856_v59 }
 0x163   : > { %v982_v56 = vpop.permute.xlu1 %981 }
 0x164   : > { %v966_v44 = vpop.permute.xlu0 %965  ;;  %v1993_v24 = vsel %vm1963_vm6, %v1960_v9, %v982_v56 }
 0x165   : > { %v1977_v8 = vsel %vm1963_vm6, %v1944_v19, %v966_v44 }
 0x167   : > { %v984_v1 = vpop.permute.xlu1 %983 }
 0x168   : > { %v968_v6 = vpop.permute.xlu0 %967  ;;  %v1995_v38 = vsel %vm1963_vm6, %v1962_v12, %v984_v1 }
 0x169   : > { %v1979_v46 = vsel %vm1963_vm6, %v1946_v27, %v968_v6 }
 0x16b   : > { %v1254_v14 = vpop.permute.xlu1 %1253 }
 0x16c   : > { %v1238_v34 = vpop.permute.xlu0 %1237  ;;  %v2026_v29 = vsel %vm1996_vm7, %v1993_v24, %v1254_v14 }
 0x16d   : > { %v2010_v25 = vsel %vm1996_vm7, %v1977_v8, %v1238_v34 }
 0x16f   : > { %v1256_v57 = vpop.permute.xlu1 %1255 }
 0x170   : > { %v1240_v35 = vpop.permute.xlu0 %1239  ;;  %v2028_v7 = vsel %vm1996_vm7, %v1995_v38, %v1256_v57 }
 0x171   : > { %v2012_v5 = vsel %vm1996_vm7, %v1979_v46, %v1240_v35 }
 0x173   : > { %v1382_v11 = vpop.permute.xlu1 %1381 }
 0x174   : > { %v1366_v52 = vpop.permute.xlu0 %1365  ;;  %v2059_v40 = vsel %vm2029_vm8, %v2026_v29, %v1382_v11 }
 0x175   : > { %v2043_v13 = vsel %vm2029_vm8, %v2010_v25, %v1366_v52 }
 0x177   : > { %v1384_v37 = vpop.permute.xlu1 %1383 }
 0x178   : > { %v1368_v55 = vpop.permute.xlu0 %1367  ;;  %v2061_v54 = vsel %vm2029_vm8, %v2028_v7, %v1384_v37 }
 0x179   : > { %v2045_v3 = vsel %vm2029_vm8, %v2012_v5, %v1368_v55 }
 0x17b   : > { %v1494_v21 = vpop.permute.xlu1 %1493 }
 0x17c   : > { %v1478_v22 = vpop.permute.xlu0 %1477  ;;  %v2092_v15 = vsel %vm2062_vm9, %v2059_v40, %v1494_v21 }
 0x17d   : > { %v2076_v20 = vsel %vm2062_vm9, %v2043_v13, %v1478_v22 }
 0x17f   : > { %v1496_v53 = vpop.permute.xlu1 %1495 }
 0x180   : > { %v1480_v48 = vpop.permute.xlu0 %1479  ;;  %v2094_v4 = vsel %vm2062_vm9, %v2061_v54, %v1496_v53 }
 0x181   : > { %v2078_v36 = vsel %vm2062_vm9, %v2045_v3, %v1480_v48 }
 0x183   : > { %v1766_v63 = vpop.permute.xlu1 %1765 }
 0x184   : > { %v1750_v61 = vpop.permute.xlu0 %1749  ;;  %v2125_v0 = vsel %vm2095_vm10, %v2092_v15, %v1766_v63 }
 0x185   : > { %v2109_v32 = vsel %vm2095_vm10, %v2076_v20, %v1750_v61 }
 0x187   : > { %v1768_v30 = vpop.permute.xlu1 %1767 }
 0x188   : > { %v1752_v60 = vpop.permute.xlu0 %1751  ;;  %v2127_v42 = vsel %vm2095_vm10, %v2094_v4, %v1768_v30 }
 0x189   : > { %v2111_v26 = vsel %vm2095_vm10, %v2078_v36, %v1752_v60 }
 0x18b   : > { %v1894_v33 = vpop.permute.xlu1 %1893 }
 0x18c   : > { %v2158_v51 = vsel %vm2128_vm11, %v2125_v0, %v1894_v33  ;;  %v1878_v58 = vpop.permute.xlu0 %1877 }
 0x18d   : > { %v2142_v16 = vsel %vm2128_vm11, %v2109_v32, %v1878_v58  ;;  %3142 = vmatprep.mubr.msk.bf16.mxu1 %vm2176_vm12, %v2158_v51 }
 0x18e   : > { %3126 = vmatprep.mubr.msk.bf16.mxu0 %vm2176_vm12, %v2142_v16 }
 0x18f   : > { %v1896_v49 = vpop.permute.xlu1 %1895 }
 0x190   : > { %v2160_v62 = vsel %vm2128_vm11, %v2127_v42, %v1896_v49  ;;  %v1880_v47 = vpop.permute.xlu0 %1879 }
 0x191   : > { %v2144_v10 = vsel %vm2128_vm11, %v2111_v26, %v1880_v47  ;;  %3143 = vmatmul.mubr.msk.bf16.gmra.mrb[12].mxu1 %vm2176_vm12, %v2160_v62 }
 0x192   : > { %3127 = vmatmul.mubr.msk.bf16.gmra.mrb[12].mxu0 %vm2176_vm12, %v2144_v10 }
 0x1a8   : > { %v3132_v50 = vpop.f32.mrb[0].mxu1 }
 0x1a9   : > { %v3116_v2 = vpop.f32.mrb[0].mxu0  ;;  %v2402_v18 = vmul.f32 %v3132_v50, %v4714_v39  ;;  %v2314_v31 = vpop.f32.mrb[1].mxu1 }
 0x1aa   : > { %v2386_v43 = vmul.f32 %v3116_v2, %v4714_v39  ;;  %v2250_v59 = vpop.f32.mrb[1].mxu0  ;;  %v2400_v56 = vmul.f32 %v4714_v39, %v2314_v31  ;;  %v3133_v44 = vpop.f32.mrb[2].mxu1 }
 0x1ab   : > { %v2441_v1 = vadd.f32 %v4720_v41, %v2402_v18  ;;  %v2384_v6 = vmul.f32 %v4714_v39, %v2250_v59  ;;  %v3117_v14 = vpop.f32.mrb[2].mxu0  ;;  %v2403_v34 = vmul.f32 %v3133_v44, %v4714_v39  ;;  %v2317_v57 = vpop.f32.mrb[3].mxu1 }
 0x1ac   : > { %v2425_v35 = vadd.f32 %v4720_v41, %v2386_v43  ;;  %v2439_v11 = vadd.f32 %v4720_v41, %v2400_v56  ;;  %v2387_v52 = vmul.f32 %v3117_v14, %v4714_v39  ;;  %v2253_v37 = vpop.f32.mrb[3].mxu0  ;;  %v2401_v55 = vmul.f32 %v4714_v39, %v2317_v57 }
 0x1ad   : > { %v2473_v21 = vmax.f32 %v2441_v1, 0.0  ;;  %v2423_v22 = vadd.f32 %v4720_v41, %v2384_v6  ;;  %v2442_v53 = vadd.f32 %v4720_v41, %v2403_v34  ;;  %v2385_v48 = vmul.f32 %v4714_v39, %v2253_v37 }
 0x1ae   : > { %v2457_v63 = vmax.f32 %v2425_v35, 0.0  ;;  %v2471_v61 = vmax.f32 %v2439_v11, 0.0  ;;  %v2426_v28 = vadd.f32 %v4720_v41, %v2387_v52  ;;  %v2440_v23 = vadd.f32 %v4720_v41, %v2401_v55 }
 0x1af   : > { %v3077_v9 = vpack.c.bf16 %v2473_v21, %v2473_v21  ;;  %v2455_v19 = vmax.f32 %v2423_v22, 0.0  ;;  %v2474_v24 = vmax.f32 %v2442_v53, 0.0  ;;  %v2424_v30 = vadd.f32 %v4720_v41, %v2385_v48 }
 0x1b0   : > { %v3061_v8 = vpack.c.bf16 %v2457_v63, %v2457_v63  ;;  %v3075_v29 = vpack.c.bf16 %v2471_v61, %v2471_v61  ;;  %v2458_v60 = vmax.f32 %v2426_v28, 0.0  ;;  %v2472_v17 = vmax.f32 %v2440_v23, 0.0 }
 0x1b1   : > { %2634 = vst.msk [vmem:[%s4740_s7 + $0x48] sm:$0xf] %vm2615_vm13, %v3077_v9  ;;  %v3059_v25 = vpack.c.bf16 %v2455_v19, %v2455_v19  ;;  %v3078_v40 = vpack.c.bf16 %v2474_v24, %v2474_v24  ;;  %v2456_v45 = vmax.f32 %v2424_v30, 0.0 }
 0x1b2   : > { %2618 = vst.msk [vmem:[%s4740_s7 + $0x8] sm:$0xf] %vm2615_vm13, %v3061_v8  ;;  %2632 = vst.msk [vmem:[%s4740_s7 + $0x40] sm:$0xf] %vm2615_vm13, %v3075_v29  ;;  %v3062_v12 = vpack.c.bf16 %v2458_v60, %v2458_v60  ;;  %v3076_v13 = vpack.c.bf16 %v2472_v17, %v2472_v17 }
 0x1b3   : > { %2616 = vst.msk [vmem:[%s4740_s7] sm:$0xf] %vm2615_vm13, %v3059_v25  ;;  %2635 = vst.msk [vmem:[%s4740_s7 + $0x4c] sm:$0xf] %vm2615_vm13, %v3078_v40  ;;  %v3060_v15 = vpack.c.bf16 %v2456_v45, %v2456_v45 }
 0x1b4   : > { %2619 = vst.msk [vmem:[%s4740_s7 + $0xc] sm:$0xf] %vm2615_vm13, %v3062_v12  ;;  %2633 = vst.msk [vmem:[%s4740_s7 + $0x44] sm:$0xf] %vm2615_vm13, %v3076_v13 }
 0x1b5   : > { %2617 = vst.msk [vmem:[%s4740_s7 + $0x4] sm:$0xf] %vm2615_vm13, %v3060_v15 }
 0x1e8   : > { %v3136_v27 = vpop.f32.mrb[4].mxu1 }
 0x1e9   : > { %v3120_v38 = vpop.f32.mrb[4].mxu0  ;;  %v2406_v20 = vmul.f32 %v3136_v27, %v4714_v39  ;;  %v2330_v0 = vpop.f32.mrb[5].mxu1 }
 0x1ea   : > { %v2390_v33 = vmul.f32 %v3120_v38, %v4714_v39  ;;  %v2266_v46 = vpop.f32.mrb[5].mxu0  ;;  %v2404_v7 = vmul.f32 %v4714_v39, %v2330_v0  ;;  %v3137_v32 = vpop.f32.mrb[6].mxu1 }
 0x1eb   : > { %v2445_v51 = vadd.f32 %v4720_v41, %v2406_v20  ;;  %v2388_v58 = vmul.f32 %v4714_v39, %v2266_v46  ;;  %v3121_v5 = vpop.f32.mrb[6].mxu0  ;;  %v2407_v54 = vmul.f32 %v3137_v32, %v4714_v39  ;;  %v2333_v16 = vpop.f32.mrb[7].mxu1 }
 0x1ec   : > { %v2429_v3 = vadd.f32 %v4720_v41, %v2390_v33  ;;  %v2443_v4 = vadd.f32 %v4720_v41, %v2404_v7  ;;  %v2391_v36 = vmul.f32 %v3121_v5, %v4714_v39  ;;  %v2269_v42 = vpop.f32.mrb[7].mxu0  ;;  %v2405_v49 = vmul.f32 %v4714_v39, %v2333_v16 }
 0x1ed   : > { %v2477_v26 = vmax.f32 %v2445_v51, 0.0  ;;  %v2427_v62 = vadd.f32 %v4720_v41, %v2388_v58  ;;  %v2446_v47 = vadd.f32 %v4720_v41, %v2407_v54  ;;  %v2389_v10 = vmul.f32 %v4714_v39, %v2269_v42 }
 0x1ee   : > { %v2461_v50 = vmax.f32 %v2429_v3, 0.0  ;;  %v2475_v2 = vmax.f32 %v2443_v4, 0.0  ;;  %v2430_v18 = vadd.f32 %v4720_v41, %v2391_v36  ;;  %v2444_v31 = vadd.f32 %v4720_v41, %v2405_v49 }
 0x1ef   : > { %v3081_v43 = vpack.c.bf16 %v2477_v26, %v2477_v26  ;;  %v2459_v59 = vmax.f32 %v2427_v62, 0.0  ;;  %v2478_v56 = vmax.f32 %v2446_v47, 0.0  ;;  %v2428_v44 = vadd.f32 %v4720_v41, %v2389_v10 }
 0x1f0   : > { %v3065_v1 = vpack.c.bf16 %v2461_v50, %v2461_v50  ;;  %v3079_v6 = vpack.c.bf16 %v2475_v2, %v2475_v2  ;;  %v2462_v14 = vmax.f32 %v2430_v18, 0.0  ;;  %v2476_v34 = vmax.f32 %v2444_v31, 0.0 }
 0x1f1   : > { %2638 = vst.msk [vmem:[%s4740_s7 + $0x58] sm:$0xf] %vm2615_vm13, %v3081_v43  ;;  %v3063_v57 = vpack.c.bf16 %v2459_v59, %v2459_v59  ;;  %v3082_v35 = vpack.c.bf16 %v2478_v56, %v2478_v56  ;;  %v2460_v11 = vmax.f32 %v2428_v44, 0.0 }
 0x1f2   : > { %2622 = vst.msk [vmem:[%s4740_s7 + $0x18] sm:$0xf] %vm2615_vm13, %v3065_v1  ;;  %2636 = vst.msk [vmem:[%s4740_s7 + $0x50] sm:$0xf] %vm2615_vm13, %v3079_v6  ;;  %v3066_v52 = vpack.c.bf16 %v2462_v14, %v2462_v14  ;;  %v3080_v37 = vpack.c.bf16 %v2476_v34, %v2476_v34 }
 0x1f3   : > { %2620 = vst.msk [vmem:[%s4740_s7 + $0x10] sm:$0xf] %vm2615_vm13, %v3063_v57  ;;  %2639 = vst.msk [vmem:[%s4740_s7 + $0x5c] sm:$0xf] %vm2615_vm13, %v3082_v35  ;;  %v3064_v55 = vpack.c.bf16 %v2460_v11, %v2460_v11 }
 0x1f4   : > { %2623 = vst.msk [vmem:[%s4740_s7 + $0x1c] sm:$0xf] %vm2615_vm13, %v3066_v52  ;;  %2637 = vst.msk [vmem:[%s4740_s7 + $0x54] sm:$0xf] %vm2615_vm13, %v3080_v37 }
 0x1f5   : > { %2621 = vst.msk [vmem:[%s4740_s7 + $0x14] sm:$0xf] %vm2615_vm13, %v3064_v55 }
 0x228   : > { %v3140_v21 = vpop.f32.mrb[8].mxu1 }
 0x229   : > { %v3124_v22 = vpop.f32.mrb[8].mxu0  ;;  %v2410_v53 = vmul.f32 %v3140_v21, %v4714_v39  ;;  %v2346_v48 = vpop.f32.mrb[9].mxu1 }
 0x22a   : > { %v2394_v63 = vmul.f32 %v3124_v22, %v4714_v39  ;;  %v2282_v61 = vpop.f32.mrb[9].mxu0  ;;  %v2408_v28 = vmul.f32 %v4714_v39, %v2346_v48  ;;  %v3141_v23 = vpop.f32.mrb[10].mxu1 }
 0x22b   : > { %v2449_v9 = vadd.f32 %v4720_v41, %v2410_v53  ;;  %v2392_v19 = vmul.f32 %v4714_v39, %v2282_v61  ;;  %v3125_v24 = vpop.f32.mrb[10].mxu0  ;;  %v2411_v30 = vmul.f32 %v3141_v23, %v4714_v39  ;;  %v2349_v8 = vpop.f32.mrb[11].mxu1 }
 0x22c   : > { %v2433_v29 = vadd.f32 %v4720_v41, %v2394_v63  ;;  %v2447_v60 = vadd.f32 %v4720_v41, %v2408_v28  ;;  %v2395_v17 = vmul.f32 %v3125_v24, %v4714_v39  ;;  %v2285_v25 = vpop.f32.mrb[11].mxu0  ;;  %v2409_v40 = vmul.f32 %v4714_v39, %v2349_v8 }
 0x22d   : > { %v2481_v45 = vmax.f32 %v2449_v9, 0.0  ;;  %v2431_v12 = vadd.f32 %v4720_v41, %v2392_v19  ;;  %v2450_v13 = vadd.f32 %v4720_v41, %v2411_v30  ;;  %v2393_v15 = vmul.f32 %v4714_v39, %v2285_v25 }
 0x22e   : > { %v2465_v27 = vmax.f32 %v2433_v29, 0.0  ;;  %v2479_v38 = vmax.f32 %v2447_v60, 0.0  ;;  %v2434_v20 = vadd.f32 %v4720_v41, %v2395_v17  ;;  %v2448_v0 = vadd.f32 %v4720_v41, %v2409_v40 }
 0x22f   : > { %v3085_v33 = vpack.c.bf16 %v2481_v45, %v2481_v45  ;;  %v2463_v46 = vmax.f32 %v2431_v12, 0.0  ;;  %v2482_v7 = vmax.f32 %v2450_v13, 0.0  ;;  %v2432_v32 = vadd.f32 %v4720_v41, %v2393_v15 }
 0x230   : > { %v3069_v51 = vpack.c.bf16 %v2465_v27, %v2465_v27  ;;  %v3083_v58 = vpack.c.bf16 %v2479_v38, %v2479_v38  ;;  %v2466_v5 = vmax.f32 %v2434_v20, 0.0  ;;  %v2480_v54 = vmax.f32 %v2448_v0, 0.0 }
 0x231   : > { %2642 = vst.msk [vmem:[%s4740_s7 + $0x68] sm:$0xf] %vm2615_vm13, %v3085_v33  ;;  %v3067_v16 = vpack.c.bf16 %v2463_v46, %v2463_v46  ;;  %v3086_v3 = vpack.c.bf16 %v2482_v7, %v2482_v7  ;;  %v2464_v4 = vmax.f32 %v2432_v32, 0.0 }
 0x232   : > { %2626 = vst.msk [vmem:[%s4740_s7 + $0x28] sm:$0xf] %vm2615_vm13, %v3069_v51  ;;  %2640 = vst.msk [vmem:[%s4740_s7 + $0x60] sm:$0xf] %vm2615_vm13, %v3083_v58  ;;  %v3070_v36 = vpack.c.bf16 %v2466_v5, %v2466_v5  ;;  %v3084_v42 = vpack.c.bf16 %v2480_v54, %v2480_v54 }
 0x233   : > { %2624 = vst.msk [vmem:[%s4740_s7 + $0x20] sm:$0xf] %vm2615_vm13, %v3067_v16  ;;  %2643 = vst.msk [vmem:[%s4740_s7 + $0x6c] sm:$0xf] %vm2615_vm13, %v3086_v3  ;;  %v3068_v49 = vpack.c.bf16 %v2464_v4, %v2464_v4 }
 0x234   : > { %2627 = vst.msk [vmem:[%s4740_s7 + $0x2c] sm:$0xf] %vm2615_vm13, %v3070_v36  ;;  %2641 = vst.msk [vmem:[%s4740_s7 + $0x64] sm:$0xf] %vm2615_vm13, %v3084_v42 }
 0x235   : > { %2625 = vst.msk [vmem:[%s4740_s7 + $0x24] sm:$0xf] %vm2615_vm13, %v3068_v49 }
 0x264   : > { %v3144_v26 = vpop.f32.mrb[12].mxu1 }
 0x265   : > { %v3128_v62 = vpop.f32.mrb[12].mxu0  ;;  %v2414_v47 = vmul.f32 %v3144_v26, %v4714_v39  ;;  %v2362_v10 = vpop.f32.mrb[13].mxu1 }
 0x266   : > { %v2398_v50 = vmul.f32 %v3128_v62, %v4714_v39  ;;  %v2298_v2 = vpop.f32.mrb[13].mxu0  ;;  %v2412_v18 = vmul.f32 %v4714_v39, %v2362_v10  ;;  %v3145_v31 = vpop.f32.mrb[14].mxu1 }
 0x267   : > { %v2453_v43 = vadd.f32 %v4720_v41, %v2414_v47  ;;  %v2396_v59 = vmul.f32 %v4714_v39, %v2298_v2  ;;  %v3129_v56 = vpop.f32.mrb[14].mxu0  ;;  %v2415_v44 = vmul.f32 %v3145_v31, %v4714_v39  ;;  %v2365_v1 = vpop.f32.mrb[15].mxu1 }
 0x268   : > { %v2437_v6 = vadd.f32 %v4720_v41, %v2398_v50  ;;  %v2451_v14 = vadd.f32 %v4720_v41, %v2412_v18  ;;  %v2399_v34 = vmul.f32 %v3129_v56, %v4714_v39  ;;  %v2301_v57 = vpop.f32.mrb[15].mxu0  ;;  %v2413_v35 = vmul.f32 %v4714_v39, %v2365_v1 }
 0x269   : > { %v2485_v11 = vmax.f32 %v2453_v43, 0.0  ;;  %v2435_v52 = vadd.f32 %v4720_v41, %v2396_v59  ;;  %v2454_v37 = vadd.f32 %v4720_v41, %v2415_v44  ;;  %v2397_v55 = vmul.f32 %v4714_v39, %v2301_v57 }
 0x26a   : > { %v2469_v21 = vmax.f32 %v2437_v6, 0.0  ;;  %v2483_v22 = vmax.f32 %v2451_v14, 0.0  ;;  %v2438_v53 = vadd.f32 %v4720_v41, %v2399_v34  ;;  %v2452_v48 = vadd.f32 %v4720_v41, %v2413_v35 }
 0x26b   : > { %v3089_v63 = vpack.c.bf16 %v2485_v11, %v2485_v11  ;;  %v2467_v61 = vmax.f32 %v2435_v52, 0.0  ;;  %v2486_v28 = vmax.f32 %v2454_v37, 0.0  ;;  %v2436_v23 = vadd.f32 %v4720_v41, %v2397_v55 }
 0x26c   : > { %v3073_v9 = vpack.c.bf16 %v2469_v21, %v2469_v21  ;;  %v3087_v19 = vpack.c.bf16 %v2483_v22, %v2483_v22  ;;  %v2470_v39 = vmax.f32 %v2438_v53, 0.0  ;;  %v2484_v24 = vmax.f32 %v2452_v48, 0.0 }
 0x26d   : > { %2646 = vst.msk [vmem:[%s4740_s7 + $0x78] sm:$0xf] %vm2615_vm13, %v3089_v63  ;;  %v3071_v30 = vpack.c.bf16 %v2467_v61, %v2467_v61  ;;  %v3090_v8 = vpack.c.bf16 %v2486_v28, %v2486_v28  ;;  %v2468_v29 = vmax.f32 %v2436_v23, 0.0 }
 0x26e   : > { %2630 = vst.msk [vmem:[%s4740_s7 + $0x38] sm:$0xf] %vm2615_vm13, %v3073_v9  ;;  %2644 = vst.msk [vmem:[%s4740_s7 + $0x70] sm:$0xf] %vm2615_vm13, %v3087_v19  ;;  %v3074_v41 = vpack.c.bf16 %v2470_v39, %v2470_v39  ;;  %v3088_v60 = vpack.c.bf16 %v2484_v24, %v2484_v24 }
 0x26f   : > { %2628 = vst.msk [vmem:[%s4740_s7 + $0x30] sm:$0xf] %vm2615_vm13, %v3071_v30  ;;  %2647 = vst.msk [vmem:[%s4740_s7 + $0x7c] sm:$0xf] %vm2615_vm13, %v3090_v8  ;;  %v3072_v17 = vpack.c.bf16 %v2468_v29, %v2468_v29 }
 0x270   : > { %2631 = vst.msk [vmem:[%s4740_s7 + $0x3c] sm:$0xf] %vm2615_vm13, %v3074_v41  ;;  %2645 = vst.msk [vmem:[%s4740_s7 + $0x74] sm:$0xf] %vm2615_vm13, %v3088_v60 }
 0x271   : > { %2629 = vst.msk [vmem:[%s4740_s7 + $0x34] sm:$0xf] %vm2615_vm13, %v3072_v17 }
 0x272   : > { %3360 = shalt.err (!%p3357_p3)
}
 0x273   : > { %s3361_s23 = scalar_lea.hbm %s4849_s11, 2048  ;;  %s3365_s29 = scalar_lea.hbm %s4910_s4, 4096 }
 0x274   : > { %p3362_p4 = scmp.ne.s32.totalorder %s4849_s11, %s3361_s23  ;;  %p3366_p9 = scmp.lt.u32.totalorder %s4849_s11, %s4910_s4 }
 0x275   : > { %p3367_p10 = scmp.lt.u32.totalorder %s3365_s29, %s3361_s23  ;;  %p3369_p12 = scmp.lt.u32.totalorder %s3361_s23, %s4849_s11 }
 0x276   : > { %p3363_p7 = pnand %p3362_p4, %p3486_p5 }
 0x277   : > { %p3368_p11 = por %p3367_p10, %p3366_p9 }
 0x278   : > { %p3364_p8 = pneg %p3363_p7 }
 0x279   : > { %p3370_p13 = por %p3369_p12, %p3368_p11 }
 0x27b   : > { %p3371_p0 = pnand %p3370_p13, %p3364_p8 }
 0x27d   : > { %3374 = shalt.err (!%p3371_p0)
}
 0x27e   : > { %s3421_s6 = smov 64   ;;  %s3422_s7 = smov 4  }
 0x27f   : > { %3151 = dma.vmem_to_hbm [thread:$0]  (%p3486_p5), %s4851_s9, 2048, %s4849_s11, %s4865_s12, %s3421_s6, %s3421_s6, %s3422_s7  }
 0x280 PF: > { %p3157_p1 = scmp.ge.s32.totalorder %s3409_s18, 2  ;;  %s2677_s8 = sand.u32 1, %s3397_s15  }
 0x281   : > { %s2678_s19 = scalar_lea.sflag [#allocation3], %s2677_s8 }
 0x282   : > { %p3154_p2 = pnand %p3157_p1, %p3490_p6 }
 0x284   : > { %3392 = dma.done.wait (!%p3154_p2), %s2678_s19, 2048  }
 0x285   : > { %3394 = vsyncadd (!%p3154_p2), %s2678_s19, 4294965248  ;;  %p14_p3 = scmp.ge.s32.totalorder %s3473_s21, 4   ;;  %s4931_s15 = smov %s3401_s16 }
 0x286   : > { %s4932_s16 = smov %s3405_s17  ;;  %s4933_s17 = smov %s3484_s24 }
 0x287   : > { %s4934_s18 = smov %s3473_s21  ;;  %16 = sbr.rel (!%p14_p3) target bundleno = 3 (0x3), region = 73 }
 0x28e   :  { %2683 = vsyncpa [#allocation3], 1 }
 0x28f   :  { %2685 = vsyncpa [#allocation3 + $0x1], 1 }

</bundles_post_ra>
